<compile_context>
chip_gen: v7x
topology: tpu7x:2x2x1
jax: 0.10.0
libtpu: 0.0.40
codegen_flags: <defaults>
</compile_context>

<pallas_src>
import numpy as np
import jax
import jax.numpy as jnp
from jax.experimental import pallas as pl
from jax.experimental.pallas import tpu as pltpu

NUM_BUCKETS = 256
# nn.Parameter(torch.linspace(0.0025, 0.024, 257 - 1), requires_grad=False)
_EPOLEN_BINS_NP = np.linspace(0.0024999999999995026, 0.02400000000000002,
                              NUM_BUCKETS).astype(np.float32)
EPOLEN_BINS = jnp.asarray(_EPOLEN_BINS_NP)
# bucket(v) == k  <=>  lo[k] < v <= hi[k]   (count of bins strictly < v,
# clamped to 255 so the overflow bucket maps to the last class).
_BINS_LO_NP = np.concatenate(([-3.0e38], _EPOLEN_BINS_NP[:-1])).astype(np.float32)
_BINS_HI_NP = np.concatenate((_EPOLEN_BINS_NP[:-1], [3.0e38])).astype(np.float32)
# `self.phase` parameter is never used in forward(); not needed here.


def _round_up(x, m):
    return ((x + m - 1) // m) * m


def _fastspeech2_loss_kernel(
    # ---- VMEM-resident small inputs (constant index maps) ----
    dur_pred_ref,     # (B, Ttxt)   log-duration predictions (any float dtype)
    dur_tgt_ref,      # (B, Ttxt)   linear-domain duration targets
    txt_mask_ref,     # (B, Ttxt)   f32, 1.0 = valid
    bins_lo_ref,      # (1, C)      f32 lower bucket edges
    bins_hi_ref,      # (1, C)      f32 upper bucket edges
    # ---- per-(batch, T-block) tiled inputs ----
    mel_pred_ref,     # (1, Tblk, n_mel)
    mel_tgt_ref,      # (1, n_mel, Tblk)   native target layout
    ph_pred_ref,      # (1, Tblk, n_ph)
    ph_tgt_ref,       # (1, n_ph, Tblk)    native target layout
    logits_ref,       # (1, Tblk, C)
    epolen_tgt_ref,   # (1, Tblk, 1)
    ac_mask_ref,      # (1, Tblk, 1)  f32, 1.0 = valid
    # ---- output ----
    out_ref,          # (8,) f32 SMEM
    # ---- scratch ----
    acc_ref,          # (8,) f32 SMEM: [mel_abs, mel_sq, ph_abs, ph_sq, ce, ac_cnt, -, -]
):
    b = pl.program_id(0)
    t = pl.program_id(1)
    nb = pl.num_programs(0)
    nt = pl.num_programs(1)

    @pl.when(jnp.logical_and(b == 0, t == 0))
    def _init():
        for i in range(8):
            acc_ref[i] = 0.0

    mask_col = ac_mask_ref[0]                               # (Tblk, 1) f32, {0,1}
    n_valid = jnp.sum(mask_col)

    # ---- mel / phase masked L1 & L2 partial sums ----
    # Compute in (frames, features) layout; targets are transposed per-tile on
    # the XLU instead of a full HBM transpose in XLA glue.
    mel_diff = (mel_pred_ref[0].astype(jnp.float32)
                - mel_tgt_ref[0].astype(jnp.float32).T) * mask_col
    ph_diff = (ph_pred_ref[0].astype(jnp.float32)
               - ph_tgt_ref[0].astype(jnp.float32).T) * mask_col

    # ---- epoch-length cross entropy (log-softmax + one-hot gather) ----
    logits = logits_ref[0].astype(jnp.float32)              # (Tblk, C)
    v = epolen_tgt_ref[0].astype(jnp.float32)               # (Tblk, 1)
    onehot = jnp.logical_and(v > bins_lo_ref[...],          # (Tblk, C)
                             v <= bins_hi_ref[...])
    m = jnp.max(logits, axis=-1, keepdims=True)             # (Tblk, 1)
    lse = m + jnp.log(jnp.sum(jnp.exp(logits - m), axis=-1, keepdims=True))
    picked = jnp.sum(jnp.where(onehot, logits, 0.0), axis=-1, keepdims=True)
    ce_partial = jnp.sum((lse - picked) * mask_col)

    acc_ref[0] += jnp.sum(jnp.abs(mel_diff))
    acc_ref[1] += jnp.sum(mel_diff * mel_diff)
    acc_ref[2] += jnp.sum(jnp.abs(ph_diff))
    acc_ref[3] += jnp.sum(ph_diff * ph_diff)
    acc_ref[4] += ce_partial
    acc_ref[5] += n_valid

    @pl.when(jnp.logical_and(b == nb - 1, t == nt - 1))
    def _finalize():
        n_mel = mel_pred_ref.shape[-1]
        n_ph = ph_pred_ref.shape[-1]
        ac_cnt = jnp.maximum(acc_ref[5], 1.0)

        # Duration losses: small, VMEM-resident text tensors, reduced once.
        tm = txt_mask_ref[...]                               # (B, Ttxt) f32
        dp = dur_pred_ref[...].astype(jnp.float32)
        dt = dur_tgt_ref[...].astype(jnp.float32)
        log_dt = jnp.log(jnp.where(tm > 0.0, dt, 1.0))       # guard log() at padding
        dd = (dp - log_dt) * tm
        txt_cnt = jnp.maximum(jnp.sum(tm), 1.0)
        dur_l1 = jnp.sum(jnp.abs(dd)) / txt_cnt
        dur_l2 = jnp.sum(dd * dd) / txt_cnt

        mel_l1 = acc_ref[0] / (ac_cnt * n_mel)
        mel_l2 = acc_ref[1] / (ac_cnt * n_mel)
        ph_l1 = acc_ref[2] / (ac_cnt * n_ph) / 50.0
        ph_l2 = acc_ref[3] / (ac_cnt * n_ph) / 50.0
        ce_loss = acc_ref[4] / ac_cnt
        total = mel_l1 + mel_l2 + ph_l1 + ph_l2 + dur_l1 + dur_l2 + ce_loss

        out_ref[0] = total
        out_ref[1] = mel_l1
        out_ref[2] = mel_l2
        out_ref[3] = ph_l1
        out_ref[4] = ph_l2
        out_ref[5] = dur_l1
        out_ref[6] = dur_l2
        out_ref[7] = ce_loss


def fastspeech2_loss(inputs, predictions, *, t_block=512):
    """JAX/Pallas version of FastSpeech2Loss.forward. Returns the 8-tuple of losses."""
    (_, _, _, _, _text_lens, _max_text_len, mel_targets, phase_targets,
     _acoustic_lens, _max_acoustic_len, epochdur_targets, epochlen_targets) = inputs
    (log_epochdur_predictions, mel_predictions, phase_predictions,
     epochlen_predictions, _, text_masks, acoustic_masks, _, _) = predictions

    # ---- light glue: no upcasts / transposes of the big tensors ----
    epochlen_predictions = jnp.squeeze(epochlen_predictions, -1)      # (B, Tac, C)
    B, T_ac = acoustic_masks.shape
    T_txt = text_masks.shape[1]
    n_mel = mel_predictions.shape[-1]
    n_ph = phase_predictions.shape[-1]
    C = epochlen_predictions.shape[-1]
    if C != NUM_BUCKETS:
        raise ValueError(f"expected {NUM_BUCKETS} epoch-length classes, got {C}")

    # Targets keep their native (B, D, T) layout (mirrors the PyTorch slice to T_ac).
    mel_targets = mel_targets[:, :, :T_ac]
    phase_targets = phase_targets[:, :, :T_ac]

    text_valid = jnp.logical_not(text_masks).astype(jnp.float32)      # 1.0 = valid
    ac_valid = jnp.logical_not(acoustic_masks).astype(jnp.float32)

    # T tiling: blocks must be multiples of 128 along the time axis.
    t_blk = min(int(t_block), _round_up(T_ac, 128))
    t_blk = _round_up(t_blk, 128)
    T_pad = _round_up(T_ac, t_blk)
    pad = T_pad - T_ac
    if pad:
        mel_predictions = jnp.pad(mel_predictions, ((0, 0), (0, pad), (0, 0)))
        phase_predictions = jnp.pad(phase_predictions, ((0, 0), (0, pad), (0, 0)))
        epochlen_predictions = jnp.pad(epochlen_predictions, ((0, 0), (0, pad), (0, 0)))
        mel_targets = jnp.pad(mel_targets, ((0, 0), (0, 0), (0, pad)))
        phase_targets = jnp.pad(phase_targets, ((0, 0), (0, 0), (0, pad)))
        epochlen_targets = jnp.pad(epochlen_targets, ((0, 0), (0, pad)))
        ac_valid = jnp.pad(ac_valid, ((0, 0), (0, pad)))               # padded = invalid

    epolen_tgt3 = epochlen_targets[:, :, None]                         # (B, Tpad, 1)
    ac_valid3 = ac_valid[:, :, None]                                   # (B, Tpad, 1)
    bins_lo = jnp.asarray(_BINS_LO_NP).reshape(1, NUM_BUCKETS)
    bins_hi = jnp.asarray(_BINS_HI_NP).reshape(1, NUM_BUCKETS)

    num_t = T_pad // t_blk
    grid = (B, num_t)

    operands = (
        log_epochdur_predictions, epochdur_targets, text_valid, bins_lo, bins_hi,
        mel_predictions, mel_targets, phase_predictions, phase_targets,
        epochlen_predictions, epolen_tgt3, ac_valid3,
    )

    const_map = lambda b, t: (0, 0)
    in_specs = [
        pl.BlockSpec((B, T_txt), const_map),                                   # dur_pred
        pl.BlockSpec((B, T_txt), const_map),                                   # dur_tgt
        pl.BlockSpec((B, T_txt), const_map),                                   # txt_mask
        pl.BlockSpec((1, NUM_BUCKETS), const_map),                             # bins_lo
        pl.BlockSpec((1, NUM_BUCKETS), const_map),                             # bins_hi
        pl.BlockSpec((1, t_blk, n_mel), lambda b, t: (b, t, 0)),               # mel_pred
        pl.BlockSpec((1, n_mel, t_blk), lambda b, t: (b, 0, t)),               # mel_tgt
        pl.BlockSpec((1, t_blk, n_ph), lambda b, t: (b, t, 0)),                # ph_pred
        pl.BlockSpec((1, n_ph, t_blk), lambda b, t: (b, 0, t)),                # ph_tgt
        pl.BlockSpec((1, t_blk, NUM_BUCKETS), lambda b, t: (b, t, 0)),         # logits
        pl.BlockSpec((1, t_blk, 1), lambda b, t: (b, t, 0)),                   # epolen_tgt
        pl.BlockSpec((1, t_blk, 1), lambda b, t: (b, t, 0)),                   # ac_mask
    ]
    out_spec = pl.BlockSpec((8,), lambda b, t: (0,),
                            memory_space=pltpu.MemorySpace.SMEM)

    bytes_accessed = sum(int(np.prod(a.shape)) * a.dtype.itemsize for a in operands) + 8 * 4
    flops = int(6 * B * T_pad * (n_mel + n_ph) + 8 * B * T_pad * NUM_BUCKETS + 8 * B * T_txt)
    transcendentals = int(B * T_pad * NUM_BUCKETS + B * T_pad + B * T_txt)
    cost = pl.CostEstimate(flops=flops, transcendentals=transcendentals,
                           bytes_accessed=int(bytes_accessed))

    out = pl.pallas_call(
        _fastspeech2_loss_kernel,
        out_shape=jax.ShapeDtypeStruct((8,), jnp.float32),
        grid_spec=pltpu.PrefetchScalarGridSpec(
            num_scalar_prefetch=0,
            grid=grid,
            in_specs=in_specs,
            out_specs=out_spec,
            scratch_shapes=[pltpu.SMEM((8,), jnp.float32)],
        ),
        compiler_params=pltpu.CompilerParams(
            dimension_semantics=("arbitrary", "arbitrary")),
        cost_estimate=cost,
    )(*operands)
    return tuple(out[i] for i in range(8))


def _reference_loss(inputs, predictions):
    """Pure-JAX reference with the same semantics as the PyTorch module."""
    (_, _, _, _, _, _, mel_targets, phase_targets, _, _,
     epochdur_targets, epochlen_targets) = inputs
    (log_epochdur_predictions, mel_predictions, phase_predictions,
     epochlen_predictions, _, text_masks, acoustic_masks, _, _) = predictions

    epochlen_predictions = jnp.squeeze(epochlen_predictions, -1).astype(jnp.float32)
    mel_predictions = mel_predictions.astype(jnp.float32)
    phase_predictions = phase_predictions.astype(jnp.float32)
    log_epochdur_predictions = log_epochdur_predictions.astype(jnp.float32)

    T_ac = acoustic_masks.shape[1]
    mel_t = jnp.swapaxes(mel_targets, 1, 2)[:, :T_ac, :].astype(jnp.float32)
    phase_t = jnp.swapaxes(phase_targets, 1, 2).astype(jnp.float32)
    tm = jnp.logical_not(text_masks)
    am = jnp.logical_not(acoustic_masks)
    am3 = am[:, :, None]
    n_mel = mel_predictions.shape[-1]
    n_ph = phase_predictions.shape[-1]
    ac_cnt = jnp.sum(am.astype(jnp.float32))
    txt_cnt = jnp.sum(tm.astype(jnp.float32))

    md = jnp.where(am3, mel_predictions - mel_t, 0.0)
    pd = jnp.where(am3, phase_predictions - phase_t, 0.0)
    mel_l1 = jnp.sum(jnp.abs(md)) / (ac_cnt * n_mel)
    mel_l2 = jnp.sum(md * md) / (ac_cnt * n_mel)
    ph_l1 = jnp.sum(jnp.abs(pd)) / (ac_cnt * n_ph) / 50.0
    ph_l2 = jnp.sum(pd * pd) / (ac_cnt * n_ph) / 50.0

    log_dt = jnp.log(jnp.where(tm, epochdur_targets.astype(jnp.float32), 1.0))
    dd = jnp.where(tm, log_epochdur_predictions - log_dt, 0.0)
    dur_l1 = jnp.sum(jnp.abs(dd)) / txt_cnt
    dur_l2 = jnp.sum(dd * dd) / txt_cnt

    bucket = jnp.searchsorted(EPOLEN_BINS, epochlen_targets.astype(jnp.float32),
                              side="left")
    bucket = jnp.minimum(bucket, NUM_BUCKETS - 1)
    logp = jax.nn.log_softmax(epochlen_predictions, axis=-1)
    nll = -jnp.take_along_axis(logp, bucket[:, :, None], axis=-1)[..., 0]
    ce = jnp.sum(jnp.where(am, nll, 0.0)) / ac_cnt

    total = mel_l1 + mel_l2 + ph_l1 + ph_l2 + dur_l1 + dur_l2 + ce
    return (total, mel_l1, mel_l2, ph_l1, ph_l2, dur_l1, dur_l2, ce)


if __name__ == "__main__":
    key = jax.random.PRNGKey(0)
    B, T_TXT, T_AC, N_MEL, N_PH = 2, 8, 200, 8, 8
    ks = jax.random.split(key, 8)

    text_lens = jnp.array([8, 6], dtype=jnp.int32)
    acoustic_lens = jnp.array([200, 150], dtype=jnp.int32)
    text_masks = (jnp.arange(T_TXT)[None, :] >= text_lens[:, None])       # True = pad
    acoustic_masks = (jnp.arange(T_AC)[None, :] >= acoustic_lens[:, None])

    mel_targets = jax.random.normal(ks[0], (B, N_MEL, T_AC), jnp.float32)     # (B, D, T)
    phase_targets = jax.random.normal(ks[1], (B, N_PH, T_AC), jnp.float32)    # (B, D, T)
    epochdur_targets = jax.random.uniform(ks[2], (B, T_TXT), jnp.float32, 0.5, 4.0)
    # zero-out padded durations (exercises the in-kernel log() guard)
    epochdur_targets = epochdur_targets * jnp.logical_not(text_masks).astype(jnp.float32)
    epochlen_targets = jax.random.uniform(ks[3], (B, T_AC), jnp.float32, 0.003, 0.023)

    log_epochdur_predictions = jax.random.normal(ks[4], (B, T_TXT), jnp.float32)
    mel_predictions = jax.random.normal(ks[5], (B, T_AC, N_MEL), jnp.float32)
    phase_predictions = jax.random.normal(ks[6], (B, T_AC, N_PH), jnp.float32)
    epochlen_predictions = jax.random.normal(ks[7], (B, T_AC, NUM_BUCKETS, 1), jnp.float32)

    inputs = (None, None, None, None, text_lens, T_TXT, mel_targets, phase_targets,
              acoustic_lens, T_AC, epochdur_targets, epochlen_targets)
    predictions = (log_epochdur_predictions, mel_predictions, phase_predictions,
                   epochlen_predictions, None, text_masks, acoustic_masks, None, None)

    # f32 run (T_AC=200 is not a multiple of 128 -> exercises padding + a 2x2 grid).
    losses = fastspeech2_loss(inputs, predictions, t_block=128)
    losses = jax.block_until_ready(losses)
    ref = _reference_loss(inputs, predictions)
    np.testing.assert_allclose(np.array(losses), np.array(ref), rtol=1e-4, atol=1e-4)

    # bf16 run: feed native low-precision model tensors (cast happens per-tile in-kernel).
    bf = lambda x: x.astype(jnp.bfloat16)
    inputs_bf16 = (None, None, None, None, text_lens, T_TXT, bf(mel_targets),
                   bf(phase_targets), acoustic_lens, T_AC, epochdur_targets,
                   epochlen_targets)
    predictions_bf16 = (bf(log_epochdur_predictions), bf(mel_predictions),
                        bf(phase_predictions), bf(epochlen_predictions), None,
                        text_masks, acoustic_masks, None, None)
    losses_bf16 = fastspeech2_loss(inputs_bf16, predictions_bf16, t_block=128)
    losses_bf16 = jax.block_until_ready(losses_bf16)
    ref_bf16 = _reference_loss(inputs_bf16, predictions_bf16)
    np.testing.assert_allclose(np.array(losses_bf16), np.array(ref_bf16),
                               rtol=1e-3, atol=1e-3)

    print("KERNEL_OK")
</pallas_src>

<mosaic_0001>
module attributes {stable_mosaic.version = 11 : i64} {
  func.func @_fastspeech2_loss_kernel(%arg0: i32, %arg1: i32, %arg2: memref<2x8xf32, #tpu.memory_space<vmem>>, %arg3: memref<2x8xf32, #tpu.memory_space<vmem>>, %arg4: memref<2x8xf32, #tpu.memory_space<vmem>>, %arg5: memref<1x256xf32, #tpu.memory_space<vmem>>, %arg6: memref<1x256xf32, #tpu.memory_space<vmem>>, %arg7: memref<1x128x8xf32, #tpu.memory_space<vmem>>, %arg8: memref<1x8x128xf32, #tpu.memory_space<vmem>>, %arg9: memref<1x128x8xf32, #tpu.memory_space<vmem>>, %arg10: memref<1x8x128xf32, #tpu.memory_space<vmem>>, %arg11: memref<1x128x256xf32, #tpu.memory_space<vmem>>, %arg12: memref<1x128x1xf32, #tpu.memory_space<vmem>>, %arg13: memref<1x128x1xf32, #tpu.memory_space<vmem>>, %arg14: memref<8xf32, #tpu.memory_space<smem>>, %arg15: memref<8xf32, #tpu.memory_space<smem>>) attributes {dimension_semantics = [#tpu.dimension_semantics<arbitrary>, #tpu.dimension_semantics<arbitrary>], iteration_bounds = array<i64: 2, 2>, scalar_prefetch = 0 : i64, scratch_operands = 1 : i64, tpu.core_type = #tpu.core_type<tc>, window_params = [{pipeline_mode = #tpu.pipeline_mode<synchronous>, transform_indices = @transform_0, window_bounds = array<i64: 2, 8>}, {pipeline_mode = #tpu.pipeline_mode<synchronous>, transform_indices = @transform_1, window_bounds = array<i64: 2, 8>}, {pipeline_mode = #tpu.pipeline_mode<synchronous>, transform_indices = @transform_2, window_bounds = array<i64: 2, 8>}, {pipeline_mode = #tpu.pipeline_mode<synchronous>, transform_indices = @transform_3, window_bounds = array<i64: 1, 256>}, {pipeline_mode = #tpu.pipeline_mode<synchronous>, transform_indices = @transform_4, window_bounds = array<i64: 1, 256>}, {transform_indices = @transform_5, window_bounds = array<i64: 1, 128, 8>}, {transform_indices = @transform_6, window_bounds = array<i64: 1, 8, 128>}, {transform_indices = @transform_7, window_bounds = array<i64: 1, 128, 8>}, {transform_indices = @transform_8, window_bounds = array<i64: 1, 8, 128>}, {transform_indices = @transform_9, window_bounds = array<i64: 1, 128, 256>}, {transform_indices = @transform_10, window_bounds = array<i64: 1, 128, 1>}, {transform_indices = @transform_11, window_bounds = array<i64: 1, 128, 1>}, {transform_indices = @transform_12, window_bounds = array<i64: 8>}]} {
    %c0_i32 = arith.constant 0 : i32
    %0 = arith.cmpi eq, %arg0, %c0_i32 : i32
    %c0_i32_0 = arith.constant 0 : i32
    %1 = arith.cmpi eq, %arg1, %c0_i32_0 : i32
    %2 = arith.andi %0, %1 : i1
    %3 = arith.extui %2 : i1 to i32
    %c0_i32_1 = arith.constant 0 : i32
    %4 = arith.cmpi ne, %3, %c0_i32_1 : i32
    scf.if %4 {
      %cst_44 = arith.constant 0.000000e+00 : f32
      %c0_45 = arith.constant 0 : index
      %102 = memref.load %arg15[%c0_45] : memref<8xf32, #tpu.memory_space<smem>>
      memref.store %cst_44, %arg15[%c0_45] : memref<8xf32, #tpu.memory_space<smem>>
      %cst_46 = arith.constant 0.000000e+00 : f32
      %c1_47 = arith.constant 1 : index
      %103 = memref.load %arg15[%c1_47] : memref<8xf32, #tpu.memory_space<smem>>
      memref.store %cst_46, %arg15[%c1_47] : memref<8xf32, #tpu.memory_space<smem>>
      %cst_48 = arith.constant 0.000000e+00 : f32
      %c2_49 = arith.constant 2 : index
      %104 = memref.load %arg15[%c2_49] : memref<8xf32, #tpu.memory_space<smem>>
      memref.store %cst_48, %arg15[%c2_49] : memref<8xf32, #tpu.memory_space<smem>>
      %cst_50 = arith.constant 0.000000e+00 : f32
      %c3_51 = arith.constant 3 : index
      %105 = memref.load %arg15[%c3_51] : memref<8xf32, #tpu.memory_space<smem>>
      memref.store %cst_50, %arg15[%c3_51] : memref<8xf32, #tpu.memory_space<smem>>
      %cst_52 = arith.constant 0.000000e+00 : f32
      %c4_53 = arith.constant 4 : index
      %106 = memref.load %arg15[%c4_53] : memref<8xf32, #tpu.memory_space<smem>>
      memref.store %cst_52, %arg15[%c4_53] : memref<8xf32, #tpu.memory_space<smem>>
      %cst_54 = arith.constant 0.000000e+00 : f32
      %c5_55 = arith.constant 5 : index
      %107 = memref.load %arg15[%c5_55] : memref<8xf32, #tpu.memory_space<smem>>
      memref.store %cst_54, %arg15[%c5_55] : memref<8xf32, #tpu.memory_space<smem>>
      %cst_56 = arith.constant 0.000000e+00 : f32
      %c6 = arith.constant 6 : index
      %108 = memref.load %arg15[%c6] : memref<8xf32, #tpu.memory_space<smem>>
      memref.store %cst_56, %arg15[%c6] : memref<8xf32, #tpu.memory_space<smem>>
      %cst_57 = arith.constant 0.000000e+00 : f32
      %c7 = arith.constant 7 : index
      %109 = memref.load %arg15[%c7] : memref<8xf32, #tpu.memory_space<smem>>
      memref.store %cst_57, %arg15[%c7] : memref<8xf32, #tpu.memory_space<smem>>
    } else {
    }
    %c0 = arith.constant 0 : index
    %c0_2 = arith.constant 0 : index
    %c0_3 = arith.constant 0 : index
    %5 = vector.load %arg13[%c0, %c0_2, %c0_3] : memref<1x128x1xf32, #tpu.memory_space<vmem>>, vector<1x128x1xf32>
    %6 = vector.shape_cast %5 : vector<1x128x1xf32> to vector<128x1xf32>
    %7 = vector.shape_cast %6 : vector<128x1xf32> to vector<1x128x1xf32>
    %cst = arith.constant dense<0.000000e+00> : vector<1xf32>
    %8 = vector.multi_reduction <add>, %7, %cst [1, 2] : vector<1x128x1xf32> to vector<1xf32>
    %9 = vector.shape_cast %8 : vector<1xf32> to vector<1x1x1xf32>
    %10 = vector.extract %9[0, 0, 0] : f32 from vector<1x1x1xf32>
    %c0_4 = arith.constant 0 : index
    %c0_5 = arith.constant 0 : index
    %c0_6 = arith.constant 0 : index
    %11 = vector.load %arg7[%c0_4, %c0_5, %c0_6] : memref<1x128x8xf32, #tpu.memory_space<vmem>>, vector<1x128x8xf32>
    %12 = vector.shape_cast %11 : vector<1x128x8xf32> to vector<128x8xf32>
    %c0_7 = arith.constant 0 : index
    %c0_8 = arith.constant 0 : index
    %c0_9 = arith.constant 0 : index
    %13 = vector.load %arg8[%c0_7, %c0_8, %c0_9] : memref<1x8x128xf32, #tpu.memory_space<vmem>>, vector<1x8x128xf32>
    %14 = vector.shape_cast %13 : vector<1x8x128xf32> to vector<8x128xf32>
    %15 = tpu.transpose %14, [1, 0] : vector<8x128xf32> -> vector<128x8xf32>
    %16 = arith.subf %12, %15 : vector<128x8xf32>
    %17 = vector.broadcast %6 : vector<128x1xf32> to vector<128x8xf32>
    %18 = arith.mulf %16, %17 : vector<128x8xf32>
    %c0_10 = arith.constant 0 : index
    %c0_11 = arith.constant 0 : index
    %c0_12 = arith.constant 0 : index
    %19 = vector.load %arg9[%c0_10, %c0_11, %c0_12] : memref<1x128x8xf32, #tpu.memory_space<vmem>>, vector<1x128x8xf32>
    %20 = vector.shape_cast %19 : vector<1x128x8xf32> to vector<128x8xf32>
    %c0_13 = arith.constant 0 : index
    %c0_14 = arith.constant 0 : index
    %c0_15 = arith.constant 0 : index
    %21 = vector.load %arg10[%c0_13, %c0_14, %c0_15] : memref<1x8x128xf32, #tpu.memory_space<vmem>>, vector<1x8x128xf32>
    %22 = vector.shape_cast %21 : vector<1x8x128xf32> to vector<8x128xf32>
    %23 = tpu.transpose %22, [1, 0] : vector<8x128xf32> -> vector<128x8xf32>
    %24 = arith.subf %20, %23 : vector<128x8xf32>
    %25 = vector.broadcast %6 : vector<128x1xf32> to vector<128x8xf32>
    %26 = arith.mulf %24, %25 : vector<128x8xf32>
    %c0_16 = arith.constant 0 : index
    %c0_17 = arith.constant 0 : index
    %c0_18 = arith.constant 0 : index
    %27 = vector.load %arg11[%c0_16, %c0_17, %c0_18] : memref<1x128x256xf32, #tpu.memory_space<vmem>>, vector<1x128x256xf32>
    %28 = vector.shape_cast %27 : vector<1x128x256xf32> to vector<128x256xf32>
    %c0_19 = arith.constant 0 : index
    %c0_20 = arith.constant 0 : index
    %c0_21 = arith.constant 0 : index
    %29 = vector.load %arg12[%c0_19, %c0_20, %c0_21] : memref<1x128x1xf32, #tpu.memory_space<vmem>>, vector<1x128x1xf32>
    %30 = vector.shape_cast %29 : vector<1x128x1xf32> to vector<128x1xf32>
    %c0_22 = arith.constant 0 : index
    %c0_23 = arith.constant 0 : index
    %31 = vector.load %arg5[%c0_22, %c0_23] : memref<1x256xf32, #tpu.memory_space<vmem>>, vector<1x256xf32>
    %32 = vector.broadcast %30 : vector<128x1xf32> to vector<128x256xf32>
    %33 = vector.broadcast %31 : vector<1x256xf32> to vector<128x256xf32>
    %34 = arith.cmpf ogt, %32, %33 : vector<128x256xf32>
    %c0_24 = arith.constant 0 : index
    %c0_25 = arith.constant 0 : index
    %35 = vector.load %arg6[%c0_24, %c0_25] : memref<1x256xf32, #tpu.memory_space<vmem>>, vector<1x256xf32>
    %36 = vector.broadcast %30 : vector<128x1xf32> to vector<128x256xf32>
    %37 = vector.broadcast %35 : vector<1x256xf32> to vector<128x256xf32>
    %38 = arith.cmpf ole, %36, %37 : vector<128x256xf32>
    %39 = arith.andi %34, %38 : vector<128x256xi1>
    %cst_26 = arith.constant dense<0xFF800000> : vector<128xf32>
    %40 = vector.multi_reduction <maximumf>, %28, %cst_26 [1] : vector<128x256xf32> to vector<128xf32>
    %41 = vector.shape_cast %40 : vector<128xf32> to vector<128x1xf32>
    %42 = vector.broadcast %41 : vector<128x1xf32> to vector<128x256xf32>
    %43 = arith.subf %28, %42 : vector<128x256xf32>
    %44 = math.exp %43 : vector<128x256xf32>
    %cst_27 = arith.constant dense<0.000000e+00> : vector<128xf32>
    %45 = vector.multi_reduction <add>, %44, %cst_27 [1] : vector<128x256xf32> to vector<128xf32>
    %46 = vector.shape_cast %45 : vector<128xf32> to vector<128x1xf32>
    %47 = math.log %46 : vector<128x1xf32>
    %48 = arith.addf %41, %47 : vector<128x1xf32>
    %cst_28 = arith.constant 0.000000e+00 : f32
    %49 = vector.broadcast %cst_28 : f32 to vector<128x256xf32>
    %50 = arith.select %39, %28, %49 : vector<128x256xi1>, vector<128x256xf32>
    %cst_29 = arith.constant dense<0.000000e+00> : vector<128xf32>
    %51 = vector.multi_reduction <add>, %50, %cst_29 [1] : vector<128x256xf32> to vector<128xf32>
    %52 = vector.shape_cast %51 : vector<128xf32> to vector<128x1xf32>
    %53 = arith.subf %48, %52 : vector<128x1xf32>
    %54 = arith.mulf %53, %6 : vector<128x1xf32>
    %55 = vector.shape_cast %54 : vector<128x1xf32> to vector<1x128x1xf32>
    %cst_30 = arith.constant dense<0.000000e+00> : vector<1xf32>
    %56 = vector.multi_reduction <add>, %55, %cst_30 [1, 2] : vector<1x128x1xf32> to vector<1xf32>
    %57 = vector.shape_cast %56 : vector<1xf32> to vector<1x1x1xf32>
    %58 = vector.extract %57[0, 0, 0] : f32 from vector<1x1x1xf32>
    %c0_31 = arith.constant 0 : index
    %59 = memref.load %arg15[%c0_31] : memref<8xf32, #tpu.memory_space<smem>>
    %60 = math.absf %18 : vector<128x8xf32>
    %61 = vector.shape_cast %60 : vector<128x8xf32> to vector<1x128x8xf32>
    %cst_32 = arith.constant dense<0.000000e+00> : vector<1xf32>
    %62 = vector.multi_reduction <add>, %61, %cst_32 [1, 2] : vector<1x128x8xf32> to vector<1xf32>
    %63 = vector.shape_cast %62 : vector<1xf32> to vector<1x1x1xf32>
    %64 = vector.extract %63[0, 0, 0] : f32 from vector<1x1x1xf32>
    %65 = arith.addf %59, %64 : f32
    %c0_33 = arith.constant 0 : index
    %66 = memref.load %arg15[%c0_33] : memref<8xf32, #tpu.memory_space<smem>>
    memref.store %65, %arg15[%c0_33] : memref<8xf32, #tpu.memory_space<smem>>
    %c1 = arith.constant 1 : index
    %67 = memref.load %arg15[%c1] : memref<8xf32, #tpu.memory_space<smem>>
    %68 = arith.mulf %18, %18 : vector<128x8xf32>
    %69 = vector.shape_cast %68 : vector<128x8xf32> to vector<1x128x8xf32>
    %cst_34 = arith.constant dense<0.000000e+00> : vector<1xf32>
    %70 = vector.multi_reduction <add>, %69, %cst_34 [1, 2] : vector<1x128x8xf32> to vector<1xf32>
    %71 = vector.shape_cast %70 : vector<1xf32> to vector<1x1x1xf32>
    %72 = vector.extract %71[0, 0, 0] : f32 from vector<1x1x1xf32>
    %73 = arith.addf %67, %72 : f32
    %c1_35 = arith.constant 1 : index
    %74 = memref.load %arg15[%c1_35] : memref<8xf32, #tpu.memory_space<smem>>
    memref.store %73, %arg15[%c1_35] : memref<8xf32, #tpu.memory_space<smem>>
    %c2 = arith.constant 2 : index
    %75 = memref.load %arg15[%c2] : memref<8xf32, #tpu.memory_space<smem>>
    %76 = math.absf %26 : vector<128x8xf32>
    %77 = vector.shape_cast %76 : vector<128x8xf32> to vector<1x128x8xf32>
    %cst_36 = arith.constant dense<0.000000e+00> : vector<1xf32>
    %78 = vector.multi_reduction <add>, %77, %cst_36 [1, 2] : vector<1x128x8xf32> to vector<1xf32>
    %79 = vector.shape_cast %78 : vector<1xf32> to vector<1x1x1xf32>
    %80 = vector.extract %79[0, 0, 0] : f32 from vector<1x1x1xf32>
    %81 = arith.addf %75, %80 : f32
    %c2_37 = arith.constant 2 : index
    %82 = memref.load %arg15[%c2_37] : memref<8xf32, #tpu.memory_space<smem>>
    memref.store %81, %arg15[%c2_37] : memref<8xf32, #tpu.memory_space<smem>>
    %c3 = arith.constant 3 : index
    %83 = memref.load %arg15[%c3] : memref<8xf32, #tpu.memory_space<smem>>
    %84 = arith.mulf %26, %26 : vector<128x8xf32>
    %85 = vector.shape_cast %84 : vector<128x8xf32> to vector<1x128x8xf32>
    %cst_38 = arith.constant dense<0.000000e+00> : vector<1xf32>
    %86 = vector.multi_reduction <add>, %85, %cst_38 [1, 2] : vector<1x128x8xf32> to vector<1xf32>
    %87 = vector.shape_cast %86 : vector<1xf32> to vector<1x1x1xf32>
    %88 = vector.extract %87[0, 0, 0] : f32 from vector<1x1x1xf32>
    %89 = arith.addf %83, %88 : f32
    %c3_39 = arith.constant 3 : index
    %90 = memref.load %arg15[%c3_39] : memref<8xf32, #tpu.memory_space<smem>>
    memref.store %89, %arg15[%c3_39] : memref<8xf32, #tpu.memory_space<smem>>
    %c4 = arith.constant 4 : index
    %91 = memref.load %arg15[%c4] : memref<8xf32, #tpu.memory_space<smem>>
    %92 = arith.addf %91, %58 : f32
    %c4_40 = arith.constant 4 : index
    %93 = memref.load %arg15[%c4_40] : memref<8xf32, #tpu.memory_space<smem>>
    memref.store %92, %arg15[%c4_40] : memref<8xf32, #tpu.memory_space<smem>>
    %c5 = arith.constant 5 : index
    %94 = memref.load %arg15[%c5] : memref<8xf32, #tpu.memory_space<smem>>
    %95 = arith.addf %94, %10 : f32
    %c5_41 = arith.constant 5 : index
    %96 = memref.load %arg15[%c5_41] : memref<8xf32, #tpu.memory_space<smem>>
    memref.store %95, %arg15[%c5_41] : memref<8xf32, #tpu.memory_space<smem>>
    %c1_i32 = arith.constant 1 : i32
    %97 = arith.cmpi eq, %arg0, %c1_i32 : i32
    %c1_i32_42 = arith.constant 1 : i32
    %98 = arith.cmpi eq, %arg1, %c1_i32_42 : i32
    %99 = arith.andi %97, %98 : i1
    %100 = arith.extui %99 : i1 to i32
    %c0_i32_43 = arith.constant 0 : i32
    %101 = arith.cmpi ne, %100, %c0_i32_43 : i32
    scf.if %101 {
      %c5_44 = arith.constant 5 : index
      %102 = memref.load %arg15[%c5_44] : memref<8xf32, #tpu.memory_space<smem>>
      %cst_45 = arith.constant 1.000000e+00 : f32
      %103 = arith.maximumf %102, %cst_45 : f32
      %c0_46 = arith.constant 0 : index
      %c0_47 = arith.constant 0 : index
      %104 = vector.load %arg4[%c0_46, %c0_47] : memref<2x8xf32, #tpu.memory_space<vmem>>, vector<2x8xf32>
      %c0_48 = arith.constant 0 : index
      %c0_49 = arith.constant 0 : index
      %105 = vector.load %arg2[%c0_48, %c0_49] : memref<2x8xf32, #tpu.memory_space<vmem>>, vector<2x8xf32>
      %c0_50 = arith.constant 0 : index
      %c0_51 = arith.constant 0 : index
      %106 = vector.load %arg3[%c0_50, %c0_51] : memref<2x8xf32, #tpu.memory_space<vmem>>, vector<2x8xf32>
      %cst_52 = arith.constant 0.000000e+00 : f32
      %107 = vector.broadcast %cst_52 : f32 to vector<2x8xf32>
      %108 = arith.cmpf ogt, %104, %107 : vector<2x8xf32>
      %cst_53 = arith.constant 1.000000e+00 : f32
      %109 = vector.broadcast %cst_53 : f32 to vector<2x8xf32>
      %110 = arith.select %108, %106, %109 : vector<2x8xi1>, vector<2x8xf32>
      %111 = math.log %110 : vector<2x8xf32>
      %112 = arith.subf %105, %111 : vector<2x8xf32>
      %113 = arith.mulf %112, %104 : vector<2x8xf32>
      %114 = vector.shape_cast %104 : vector<2x8xf32> to vector<1x2x8xf32>
      %cst_54 = arith.constant dense<0.000000e+00> : vector<1xf32>
      %115 = vector.multi_reduction <add>, %114, %cst_54 [1, 2] : vector<1x2x8xf32> to vector<1xf32>
      %116 = vector.shape_cast %115 : vector<1xf32> to vector<1x1x1xf32>
      %117 = vector.extract %116[0, 0, 0] : f32 from vector<1x1x1xf32>
      %cst_55 = arith.constant 1.000000e+00 : f32
      %118 = arith.maximumf %117, %cst_55 : f32
      %119 = math.absf %113 : vector<2x8xf32>
      %120 = vector.shape_cast %119 : vector<2x8xf32> to vector<1x2x8xf32>
      %cst_56 = arith.constant dense<0.000000e+00> : vector<1xf32>
      %121 = vector.multi_reduction <add>, %120, %cst_56 [1, 2] : vector<1x2x8xf32> to vector<1xf32>
      %122 = vector.shape_cast %121 : vector<1xf32> to vector<1x1x1xf32>
      %123 = vector.extract %122[0, 0, 0] : f32 from vector<1x1x1xf32>
      %124 = arith.divf %123, %118 : f32
      %125 = arith.mulf %113, %113 : vector<2x8xf32>
      %126 = vector.shape_cast %125 : vector<2x8xf32> to vector<1x2x8xf32>
      %cst_57 = arith.constant dense<0.000000e+00> : vector<1xf32>
      %127 = vector.multi_reduction <add>, %126, %cst_57 [1, 2] : vector<1x2x8xf32> to vector<1xf32>
      %128 = vector.shape_cast %127 : vector<1xf32> to vector<1x1x1xf32>
      %129 = vector.extract %128[0, 0, 0] : f32 from vector<1x1x1xf32>
      %130 = arith.divf %129, %118 : f32
      %c0_58 = arith.constant 0 : index
      %131 = memref.load %arg15[%c0_58] : memref<8xf32, #tpu.memory_space<smem>>
      %cst_59 = arith.constant 8.000000e+00 : f32
      %132 = arith.mulf %103, %cst_59 : f32
      %133 = arith.divf %131, %132 : f32
      %c1_60 = arith.constant 1 : index
      %134 = memref.load %arg15[%c1_60] : memref<8xf32, #tpu.memory_space<smem>>
      %cst_61 = arith.constant 8.000000e+00 : f32
      %135 = arith.mulf %103, %cst_61 : f32
      %136 = arith.divf %134, %135 : f32
      %c2_62 = arith.constant 2 : index
      %137 = memref.load %arg15[%c2_62] : memref<8xf32, #tpu.memory_space<smem>>
      %cst_63 = arith.constant 8.000000e+00 : f32
      %138 = arith.mulf %103, %cst_63 : f32
      %139 = arith.divf %137, %138 : f32
      %cst_64 = arith.constant 5.000000e+01 : f32
      %140 = arith.divf %139, %cst_64 : f32
      %c3_65 = arith.constant 3 : index
      %141 = memref.load %arg15[%c3_65] : memref<8xf32, #tpu.memory_space<smem>>
      %cst_66 = arith.constant 8.000000e+00 : f32
      %142 = arith.mulf %103, %cst_66 : f32
      %143 = arith.divf %141, %142 : f32
      %cst_67 = arith.constant 5.000000e+01 : f32
      %144 = arith.divf %143, %cst_67 : f32
      %c4_68 = arith.constant 4 : index
      %145 = memref.load %arg15[%c4_68] : memref<8xf32, #tpu.memory_space<smem>>
      %146 = arith.divf %145, %103 : f32
      %147 = arith.addf %133, %136 : f32
      %148 = arith.addf %147, %140 : f32
      %149 = arith.addf %148, %144 : f32
      %150 = arith.addf %149, %124 : f32
      %151 = arith.addf %150, %130 : f32
      %152 = arith.addf %151, %146 : f32
      %c0_69 = arith.constant 0 : index
      %153 = memref.load %arg14[%c0_69] : memref<8xf32, #tpu.memory_space<smem>>
      memref.store %152, %arg14[%c0_69] : memref<8xf32, #tpu.memory_space<smem>>
      %c1_70 = arith.constant 1 : index
      %154 = memref.load %arg14[%c1_70] : memref<8xf32, #tpu.memory_space<smem>>
      memref.store %133, %arg14[%c1_70] : memref<8xf32, #tpu.memory_space<smem>>
      %c2_71 = arith.constant 2 : index
      %155 = memref.load %arg14[%c2_71] : memref<8xf32, #tpu.memory_space<smem>>
      memref.store %136, %arg14[%c2_71] : memref<8xf32, #tpu.memory_space<smem>>
      %c3_72 = arith.constant 3 : index
      %156 = memref.load %arg14[%c3_72] : memref<8xf32, #tpu.memory_space<smem>>
      memref.store %140, %arg14[%c3_72] : memref<8xf32, #tpu.memory_space<smem>>
      %c4_73 = arith.constant 4 : index
      %157 = memref.load %arg14[%c4_73] : memref<8xf32, #tpu.memory_space<smem>>
      memref.store %144, %arg14[%c4_73] : memref<8xf32, #tpu.memory_space<smem>>
      %c5_74 = arith.constant 5 : index
      %158 = memref.load %arg14[%c5_74] : memref<8xf32, #tpu.memory_space<smem>>
      memref.store %124, %arg14[%c5_74] : memref<8xf32, #tpu.memory_space<smem>>
      %c6 = arith.constant 6 : index
      %159 = memref.load %arg14[%c6] : memref<8xf32, #tpu.memory_space<smem>>
      memref.store %130, %arg14[%c6] : memref<8xf32, #tpu.memory_space<smem>>
      %c7 = arith.constant 7 : index
      %160 = memref.load %arg14[%c7] : memref<8xf32, #tpu.memory_space<smem>>
      memref.store %146, %arg14[%c7] : memref<8xf32, #tpu.memory_space<smem>>
    } else {
    }
    return
  }
  func.func @transform_0(%arg0: i32, %arg1: i32) -> (i32, i32) {
    %c0_i32 = arith.constant 0 : i32
    %c0_i32_0 = arith.constant 0 : i32
    %c0_i32_1 = arith.constant 0 : i32
    return %c0_i32, %c0_i32_0 : i32, i32
  }
  func.func @transform_1(%arg0: i32, %arg1: i32) -> (i32, i32) {
    %c0_i32 = arith.constant 0 : i32
    %c0_i32_0 = arith.constant 0 : i32
    %c0_i32_1 = arith.constant 0 : i32
    return %c0_i32, %c0_i32_0 : i32, i32
  }
  func.func @transform_2(%arg0: i32, %arg1: i32) -> (i32, i32) {
    %c0_i32 = arith.constant 0 : i32
    %c0_i32_0 = arith.constant 0 : i32
    %c0_i32_1 = arith.constant 0 : i32
    return %c0_i32, %c0_i32_0 : i32, i32
  }
  func.func @transform_3(%arg0: i32, %arg1: i32) -> (i32, i32) {
    %c0_i32 = arith.constant 0 : i32
    %c0_i32_0 = arith.constant 0 : i32
    %c0_i32_1 = arith.constant 0 : i32
    return %c0_i32, %c0_i32_0 : i32, i32
  }
  func.func @transform_4(%arg0: i32, %arg1: i32) -> (i32, i32) {
    %c0_i32 = arith.constant 0 : i32
    %c0_i32_0 = arith.constant 0 : i32
    %c0_i32_1 = arith.constant 0 : i32
    return %c0_i32, %c0_i32_0 : i32, i32
  }
  func.func @transform_5(%arg0: i32, %arg1: i32) -> (i32, i32, i32) {
    %c0_i32 = arith.constant 0 : i32
    %c0_i32_0 = arith.constant 0 : i32
    return %arg0, %arg1, %c0_i32 : i32, i32, i32
  }
  func.func @transform_6(%arg0: i32, %arg1: i32) -> (i32, i32, i32) {
    %c0_i32 = arith.constant 0 : i32
    %c0_i32_0 = arith.constant 0 : i32
    return %arg0, %c0_i32, %arg1 : i32, i32, i32
  }
  func.func @transform_7(%arg0: i32, %arg1: i32) -> (i32, i32, i32) {
    %c0_i32 = arith.constant 0 : i32
    %c0_i32_0 = arith.constant 0 : i32
    return %arg0, %arg1, %c0_i32 : i32, i32, i32
  }
  func.func @transform_8(%arg0: i32, %arg1: i32) -> (i32, i32, i32) {
    %c0_i32 = arith.constant 0 : i32
    %c0_i32_0 = arith.constant 0 : i32
    return %arg0, %c0_i32, %arg1 : i32, i32, i32
  }
  func.func @transform_9(%arg0: i32, %arg1: i32) -> (i32, i32, i32) {
    %c0_i32 = arith.constant 0 : i32
    %c0_i32_0 = arith.constant 0 : i32
    return %arg0, %arg1, %c0_i32 : i32, i32, i32
  }
  func.func @transform_10(%arg0: i32, %arg1: i32) -> (i32, i32, i32) {
    %c0_i32 = arith.constant 0 : i32
    %c0_i32_0 = arith.constant 0 : i32
    return %arg0, %arg1, %c0_i32 : i32, i32, i32
  }
  func.func @transform_11(%arg0: i32, %arg1: i32) -> (i32, i32, i32) {
    %c0_i32 = arith.constant 0 : i32
    %c0_i32_0 = arith.constant 0 : i32
    return %arg0, %arg1, %c0_i32 : i32, i32, i32
  }
  func.func @transform_12(%arg0: i32, %arg1: i32) -> i32 {
    %c0_i32 = arith.constant 0 : i32
    %c0_i32_0 = arith.constant 0 : i32
    return %c0_i32 : i32
  }
}

</mosaic_0001>

<bundles_post_ra>
// kernel: tpu_custom_call.1
= control target key start
LH: loop header
LB: loop body
LE: loop exit
PB: predicated region body
PF: predicated region fallthrough
CT: control target
= control target key end

     0   :  { %s3541_s0 = inlined_call_operand.vmem [shape: f32[2,8], index: 0, kind: input, shape index: {}]   ;;  %s3542_s1 = inlined_call_operand.vmem [shape: f32[2,8], index: 1, kind: input, shape index: {}]   ;;  %s3543_s2 = inlined_call_operand.vmem [shape: f32[2,8], index: 2, kind: input, shape index: {}]   ;;  %s3544_s3 = inlined_call_operand.vmem [shape: f32[1,256], index: 3, kind: input, shape index: {}]   ;;  %s3545_s4 = inlined_call_operand.vmem [shape: f32[1,256], index: 4, kind: input, shape index: {}]   ;;  %s3546_s5 = inlined_call_operand.vmem [shape: f32[2,256,8], index: 5, kind: input, shape index: {}]   ;;  %s3547_s6 = inlined_call_operand.vmem [shape: f32[2,8,256], index: 6, kind: input, shape index: {}]   ;;  %s3548_s7 = inlined_call_operand.vmem [shape: f32[2,256,8], index: 7, kind: input, shape index: {}]   ;;  %s3549_s8 = inlined_call_operand.vmem [shape: f32[2,8,256], index: 8, kind: input, shape index: {}]   ;;  %s3550_s9 = inlined_call_operand.vmem [shape: f32[2,256,256], index: 9, kind: input, shape index: {}]   ;;  %s3551_s10 = inlined_call_operand.vmem [shape: f32[2,256,1], index: 10, kind: input, shape index: {}]   ;;  %s3552_s11 = inlined_call_operand.vmem [shape: f32[2,256,1], index: 11, kind: input, shape index: {}]   ;;  %s3553_s12 = inlined_call_operand.hbm [shape: f32[8], index: 12, kind: output, shape index: {}]  }
   0x1   :  { %3564 = sst [smem:[#allocation24_spill]] %s3541_s0 }
   0x2   :  { %3565 = sst [smem:[#allocation25_spill]] %s3542_s1 }
   0x3   :  { %3566 = sst [smem:[#allocation26_spill]] %s3543_s2 }
   0x4   :  { %3567 = sst [smem:[#allocation27_spill]] %s3544_s3 }
   0x5   :  { %3568 = sst [smem:[#allocation28_spill]] %s3553_s12 }
   0x6   :  { %17 = vsyncpa [#allocation4], 0  ;;  %s2505_s21 = smov 0   ;;  %s2507_s22 = smov 0  }
   0x7   :  { %s2509_s23 = smov 0   ;;  %s2511_s24 = smov 0  }
   0x8   :  { %s2513_s25 = smov 0  }
   0x9 LB: > { %3569 = sst [smem:[#allocation6_spill]] %s2426_s23  ;;  %s32_s27 = sadd.s32 1, %s2426_s23  ;;  %s2434_s25 = sphi %s2513_s25, %s23_s25   ;;  %s2430_s24 = sphi %s2511_s24, %s3638_s24   ;;  %s2426_s23 = sphi %s2509_s23, %s3637_s23   ;;  %s2422_s22 = sphi %s2507_s22, %s3636_s22   ;;  %s2418_s21 = sphi %s2505_s21, %s3635_s21  }
   0xa   : > { %3570 = sst [smem:[#allocation7_spill]] %s2430_s24  ;;  %p33_p0 = scmp.ge.s32.totalorder %s32_s27, 2 }
   0xb   : > { %s35_s28 = sadd.s32 1, %s2430_s24  ;;  %p2137_p1 = scmp.ge.s32.totalorder %s2434_s25, 1 }
   0xc   : > { %p476_p2 = scmp.lt.s32.totalorder %s2434_s25, 5  ;;  %s3640_s27 = smov (%p33_p0, %s32_s27), 0 }
   0xd   : > { %3571 = sst [smem:[#allocation8_spill]] %s3640_s27  ;;  %s3642_s28 = smov (!%p33_p0, %s35_s28), %s2430_s24 }
   0xe   : > { %p477_p3 = pnand %p2137_p1, %p476_p2  ;;  %p37_p4 = scmp.ge.s32.totalorder %s3642_s28, 2 }
  0x10   : > { %s3644_s28 = smov (%p37_p4, %s3642_s28), 0  ;;  %480 = sbr.rel (%p477_p3) target bundleno = 1086 (0x43e), region = 68 }
  0x11   : > { %3572 = sst [smem:[#allocation9_spill]] %s3644_s28 }
  0x17   : > { %p571_p5 = scmp.lt.s32.totalorder %s2422_s22, 1  ;;  %p582_p6 = scmp.lt.s32.totalorder %s2418_s21, 1  ;;  %v2436_v0 = vmov 0   ;;  %vm675_vm0 = vcmask 7168  }
  0x18   : > { %s2138_s29 = sshll.u32 %s2418_s21, 4  ;;  %2256 = vset.pattern.permute.xlu1 %v2436_v0  ;;  %s3584_s3 = sld [smem:[#allocation27_spill]] }
  0x19   : > { %s572_s30 = scalar_select %p571_p5, %s2422_s22, 1 }
  0x1a   : > { %s583_s13 = scalar_select %p582_p6, %s2418_s21, 1 }
  0x1b   : > { %s2141_s14 = sshll.u32 %s572_s30, 1  ;;  %p573_p7 = scmp.lt.s32.totalorder %s2138_s29, 31 }
  0x1c   : > { %s2546_s15 = sadd.s32 %s2141_s14, %s583_s13  ;;  %s2150_s17 = sshll.u32 %s572_s30, 6 }
  0x1d   : > { %s2142_s16 = sshll.u32 %s2546_s15, 3  ;;  %s2139_s26 = sshll.u32 %s572_s30, 5 }
  0x1e   : > { %s587_s20 = scalar_lea.vmem %s3547_s6, %s2142_s16  ;;  %s3646_s29 = smov (!%p573_p7, %s2138_s29), 31 }
  0x1f   : > { %v732_v1 = vld [vmem:[%s587_s20] sm:$0xff]  ;;  %s2554_s28 = sadd.s32 %s2139_s26, %s3646_s29  ;;  %s2149_s27 = sshll.u32 %s3646_s29, 1 }
  0x20   : > { %733 = vxpose.xlu0.b32.start.end [1/1] (short) %v732_v1, 128  ;;  %s613_s24 = sadd.s32 %s2150_s17, %s2149_s27  ;;  %s2626_s23 = sshll.u32 %s2554_s28, 3 }
  0x21   : > { %s2151_s13 = sshll.u32 %s613_s24, 3  ;;  %s2640_s27 = scalar_lea.vmem %s3552_s11, %s2626_s23 }
  0x22   : > { %s2559_s12 = scalar_lea.vmem %s3550_s9, %s2151_s13  ;;  %v659_v31 = vld [vmem:[%s2640_s27] sm:$0xff]  ;;  %v660_v32 = vld [vmem:[%s2640_s27 + $0x8] sm:$0xff]  ;;  %v2662_v38 = vld [vmem:[%s2640_s27 + $0x10] sm:$0xff]  ;;  %s2720_s30 = scalar_lea.vmem %s3551_s10, %s2626_s23 }
  0x23   : > { %v2562_v2 = vld [vmem:[%s2559_s12] sm:$0xff]  ;;  %v2565_v3 = vld [vmem:[%s2559_s12 + $0x8] sm:$0xff]  ;;  %v2568_v4 = vld [vmem:[%s2559_s12 + $0x10] sm:$0xff]  ;;  %v677_v36 = vsel %vm675_vm0, %v660_v32, 0.0  ;;  %v676_v37 = vsel %vm675_vm0, %v659_v31, 0.0  ;;  %v679_v43 = vsel %vm675_vm0, %v2662_v38, 0.0  ;;  %s605_s17 = scalar_lea.vmem %s3549_s8, %s2142_s16  ;;  %s3196_s19 = scalar_lea.vmem %s3546_s5, %s2626_s23 }
  0x24   : > { %v1206_v5 = vmax.f32 %v2562_v2, %v2565_v3  ;;  %v2573_v6 = vld [vmem:[%s2559_s12 + $0x18] sm:$0xff]  ;;  %v2578_v8 = vld [vmem:[%s2559_s12 + $0x20] sm:$0xff]  ;;  %v2581_v9 = vld [vmem:[%s2559_s12 + $0x28] sm:$0xff]  ;;  %v678_v42 = vadd.f32 %v677_v36, %v676_v37  ;;  %p637_p8 = scmp.eq.s32.totalorder %s2422_s22, 0  ;;  %p638_p9 = scmp.eq.s32.totalorder %s2418_s21, 0 }
  0x25   : > { %v1209_v7 = vmax.f32 %v2568_v4, %v2573_v6  ;;  %v1212_v10 = vmax.f32 %v2578_v8, %v2581_v9  ;;  %v2586_v11 = vld [vmem:[%s2559_s12 + $0x30] sm:$0xff]  ;;  %v2589_v12 = vld [vmem:[%s2559_s12 + $0x38] sm:$0xff]  ;;  %v2602_v17 = vld [vmem:[%s2559_s12 + $0x60] sm:$0xff]  ;;  %s2437_s14 = smov 0.0   ;;  %s3276_s20 = scalar_lea.vmem %s3548_s7, %s2626_s23 }
  0x26   : > { %1207 = vmax.xlane.f32.xlu1 %v1206_v5  ;;  %v1215_v13 = vmax.f32 %v2586_v11, %v2589_v12  ;;  %v2594_v14 = vld [vmem:[%s2559_s12 + $0x50] sm:$0xff]  ;;  %v2597_v15 = vld [vmem:[%s2559_s12 + $0x58] sm:$0xff]  ;;  %v2605_v18 = vld [vmem:[%s2559_s12 + $0x68] sm:$0xff]  ;;  %v680_v48 = vadd.f32 %v679_v43, %v678_v42  ;;  %p2904_p10 = pnand %p638_p9, %p637_p8  ;;  %p1847_p11 = scmp.eq.s32.totalorder %s2422_s22, 1 }
  0x27   : > { %v1221_v16 = vmax.f32 %v2594_v14, %v2597_v15  ;;  %v1224_v19 = vmax.f32 %v2602_v17, %v2605_v18  ;;  %v2610_v20 = vld [vmem:[%s2559_s12 + $0x70] sm:$0xff]  ;;  %v2613_v21 = vld [vmem:[%s2559_s12 + $0x78] sm:$0xff]  ;;  %v2618_v23 = vld [vmem:[%s2559_s12 + $0x80] sm:$0xff]  ;;  %p1848_p12 = scmp.eq.s32.totalorder %s2418_s21, 1 }
  0x28   : > { %v1227_v22 = vmax.f32 %v2610_v20, %v2613_v21  ;;  %v2621_v24 = vld [vmem:[%s2559_s12 + $0x88] sm:$0xff]  ;;  %v2629_v26 = vld [vmem:[%s2559_s12 + $0x90] sm:$0xff]  ;;  %v2632_v27 = vld [vmem:[%s2559_s12 + $0x98] sm:$0xff]  ;;  %2202 = sst [smem:[#allocation2 + $0x5]] (!%p2904_p10), %s2437_s14 }
  0x29   : > { %v1230_v25 = vmax.f32 %v2618_v23, %v2621_v24  ;;  %v1233_v28 = vmax.f32 %v2629_v26, %v2632_v27  ;;  %v2643_v29 = vld [vmem:[%s2559_s12 + $0xa0] sm:$0xff]  ;;  %v2646_v30 = vld [vmem:[%s2559_s12 + $0xa8] sm:$0xff]  ;;  %v2653_v34 = vld [vmem:[%s2559_s12 + $0xb0] sm:$0xff]  ;;  %2203 = sst [smem:[#allocation2 + $0x6]] (!%p2904_p10), %s2437_s14  ;;  %s3055_s24 = sld [smem:[#allocation2 + $0x5]] }
  0x2a   : > { %1210 = vmax.xlane.f32.xlu1 %v1209_v7  ;;  %v1236_v33 = vmax.f32 %v2643_v29, %v2646_v30  ;;  %v2656_v35 = vld [vmem:[%s2559_s12 + $0xb8] sm:$0xff]  ;;  %v2667_v40 = vld [vmem:[%s2559_s12 + $0xc0] sm:$0xff]  ;;  %v2670_v41 = vld [vmem:[%s2559_s12 + $0xc8] sm:$0xff]  ;;  %2204 = sst [smem:[#allocation2 + $0x7]] (!%p2904_p10), %s2437_s14  ;;  %p3497_p13 = pnand %p1848_p12, %p1847_p11 }
  0x2b   : > { %v1239_v39 = vmax.f32 %v2653_v34, %v2656_v35  ;;  %v662_v44 = vld [vmem:[%s2640_s27 + $0x18] sm:$0xff]  ;;  %v1242_v45 = vmax.f32 %v2667_v40, %v2670_v41  ;;  %v2678_v46 = vld [vmem:[%s2559_s12 + $0xd0] sm:$0xff]  ;;  %v663_v50 = vld [vmem:[%s2640_s27 + $0x20] sm:$0xff]  ;;  %2201 = sst [smem:[#allocation2 + $0x4]] (!%p2904_p10), %s2437_s14  ;;  %s3630_s2 = sld [smem:[#allocation26_spill]] (!%p3497_p13) }
  0x2c   : > { %v2681_v47 = vld [vmem:[%s2559_s12 + $0xd8] sm:$0xff]  ;;  %v681_v49 = vsel %vm675_vm0, %v662_v44, 0.0  ;;  %v2688_v52 = vld [vmem:[%s2559_s12 + $0xe0] sm:$0xff]  ;;  %v2691_v53 = vld [vmem:[%s2559_s12 + $0xe8] sm:$0xff]  ;;  %v683_v55 = vsel %vm675_vm0, %v663_v50, 0.0  ;;  %2197 = sst [smem:[#allocation2]] (!%p2904_p10), %s2437_s14 }
  0x2d   : > { %v1245_v51 = vmax.f32 %v2678_v46, %v2681_v47  ;;  %v682_v54 = vadd.f32 %v681_v49, %v680_v48  ;;  %v664_v56 = vld [vmem:[%s2640_s27 + $0x28] sm:$0xff]  ;;  %v1248_v57 = vmax.f32 %v2688_v52, %v2691_v53  ;;  %v2698_v58 = vld [vmem:[%s2559_s12 + $0xf0] sm:$0xff]  ;;  %v2701_v59 = vld [vmem:[%s2559_s12 + $0xf8] sm:$0xff]  ;;  %2198 = sst [smem:[#allocation2 + $0x1]] (!%p2904_p10), %s2437_s14  ;;  %s2161_s21 = sld [smem:[#allocation2 + $0x4]] }
  0x2e   : > { %1213 = vmax.xlane.f32.xlu1 %v1212_v10  ;;  %v685_v61 = vsel %vm675_vm0, %v664_v56, 0.0  ;;  %v665_v62 = vld [vmem:[%s2640_s27 + $0x30] sm:$0xff]  ;;  %v1251_v63 = vmax.f32 %v2698_v58, %v2701_v59  ;;  %v666_v5 = vld [vmem:[%s2640_s27 + $0x38] sm:$0xff]  ;;  %v990_v42 = vld [vmem:[%s2720_s30] sm:$0xff]  ;;  %2199 = sst [smem:[#allocation2 + $0x2]] (!%p2904_p10), %s2437_s14  ;;  %s1598_s13 = sld [smem:[#allocation2]] }
  0x2f   : > { %v684_v60 = vadd.f32 %v683_v55, %v682_v54  ;;  %v687_v1 = vsel %vm675_vm0, %v665_v62, 0.0  ;;  %v689_v10 = vsel %vm675_vm0, %v666_v5, 0.0  ;;  %v669_v32 = vld [vmem:[%s2640_s27 + $0x50] sm:$0xff]  ;;  %v670_v37 = vld [vmem:[%s2640_s27 + $0x58] sm:$0xff]  ;;  %v671_v44 = vld [vmem:[%s2640_s27 + $0x60] sm:$0xff]  ;;  %2200 = sst [smem:[#allocation2 + $0x3]] (!%p2904_p10), %s2437_s14 }
  0x30   : > { %v695_v36 = vsel %vm675_vm0, %v669_v32, 0.0  ;;  %v697_v43 = vsel %vm675_vm0, %v670_v37, 0.0  ;;  %v991_v48 = vld [vmem:[%s2720_s30 + $0x8] sm:$0xff]  ;;  %v699_v49 = vsel %vm675_vm0, %v671_v44, 0.0  ;;  %v992_v54 = vld [vmem:[%s2720_s30 + $0x10] sm:$0xff]  ;;  %v1001_v32 = vld [vmem:[%s2720_s30 + $0x58] sm:$0xff] }
  0x31   : > { %v672_v50 = vld [vmem:[%s2640_s27 + $0x68] sm:$0xff]  ;;  %v673_v55 = vld [vmem:[%s2640_s27 + $0x70] sm:$0xff]  ;;  %s2158_s14 = sld [smem:[#allocation2 + $0x1]]  ;;  %s3632_s0 = sld [smem:[#allocation24_spill]] (!%p3497_p13) }
  0x32   : > { %1216 = vmax.xlane.f32.xlu1 %v1215_v13  ;;  %v667_v13 = vld [vmem:[%s2640_s27 + $0x40] sm:$0xff]  ;;  %v995_v5 = vld [vmem:[%s2720_s30 + $0x28] sm:$0xff]  ;;  %s3631_s1 = sld [smem:[#allocation25_spill]] (!%p3497_p13) }
  0x36   : > { %1222 = vmax.xlane.f32.xlu1 %v1221_v16 }
  0x3a   : > { %1225 = vmax.xlane.f32.xlu1 %v1224_v19  ;;  %v691_v19 = vsel %vm675_vm0, %v667_v13, 0.0 }
  0x3e   : > { %1228 = vmax.xlane.f32.xlu1 %v1227_v22  ;;  %v668_v22 = vld [vmem:[%s2640_s27 + $0x48] sm:$0xff] }
  0x42   : > { %1231 = vmax.xlane.f32.xlu1 %v1230_v25 }
  0x46   : > { %1234 = vmax.xlane.f32.xlu1 %v1233_v28  ;;  %v693_v28 = vsel %vm675_vm0, %v668_v22, 0.0  ;;  %v998_v22 = vld [vmem:[%s2720_s30 + $0x40] sm:$0xff] }
  0x49   : > { %2257 = vset.pattern.permute.xlu0 %v2436_v0  ;;  %v686_v0 = vadd.f32 %v685_v61, %v684_v60  ;;  %v703_v60 = vsel %vm675_vm0, %v673_v55, 0.0  ;;  %v674_v61 = vld [vmem:[%s2640_s27 + $0x78] sm:$0xff] }
  0x4a   : > { %1237 = vmax.xlane.f32.xlu1 %v1236_v33 }
  0x4b   : > { %v688_v7 = vadd.f32 %v687_v1, %v686_v0  ;;  %v705_v0 = vsel %vm675_vm0, %v674_v61, 0.0 }
  0x4d   : > { %v690_v16 = vadd.f32 %v689_v10, %v688_v7  ;;  %v2739_v7 = vld [vmem:[%s2559_s12 + $0x40] sm:$0xff]  ;;  %v2742_v10 = vld [vmem:[%s2559_s12 + $0x48] sm:$0xff] }
  0x4e   : > { %1240 = vmax.xlane.f32.xlu1 %v1239_v39  ;;  %v1218_v13 = vmax.f32 %v2739_v7, %v2742_v10 }
  0x4f   : > { %v692_v25 = vadd.f32 %v691_v19, %v690_v16  ;;  %v996_v16 = vld [vmem:[%s2720_s30 + $0x30] sm:$0xff]  ;;  %v997_v19 = vld [vmem:[%s2720_s30 + $0x38] sm:$0xff] }
  0x51   : > { %v694_v33 = vadd.f32 %v693_v28, %v692_v25  ;;  %v999_v25 = vld [vmem:[%s2720_s30 + $0x48] sm:$0xff]  ;;  %v1000_v28 = vld [vmem:[%s2720_s30 + $0x50] sm:$0xff] }
  0x52   : > { %1243 = vmax.xlane.f32.xlu1 %v1242_v45 }
  0x53   : > { %v696_v39 = vadd.f32 %v695_v36, %v694_v33  ;;  %v1003_v33 = vld [vmem:[%s2720_s30 + $0x68] sm:$0xff]  ;;  %v1004_v36 = vld [vmem:[%s2720_s30 + $0x70] sm:$0xff] }
  0x55   : > { %v698_v45 = vadd.f32 %v697_v43, %v696_v39 }
  0x56   : > { %1246 = vmax.xlane.f32.xlu1 %v1245_v51 }
  0x57   : > { %v700_v51 = vadd.f32 %v699_v49, %v698_v45 }
  0x5a   : > { %1249 = vmax.xlane.f32.xlu1 %v1248_v57  ;;  %v993_v57 = vld [vmem:[%s2720_s30 + $0x18] sm:$0xff] }
  0x5e   : > { %1252 = vmax.xlane.f32.xlu1 %v1251_v63  ;;  %v994_v63 = vld [vmem:[%s2720_s30 + $0x20] sm:$0xff] }
  0x6f   : > { %783 = vperm.xlu1 %2256, %v659_v31   ;;  %v701_v31 = vsel %vm675_vm0, %v672_v50, 0.0 }
  0x70   : > { %v702_v56 = vadd.f32 %v701_v31, %v700_v51 }
  0x72   : > { %v704_v62 = vadd.f32 %v703_v60, %v702_v56 }
  0x73   : > { %1009 = vperm.xlu1 %2256, %v990_v42  }
  0x74   : > { %v706_v1 = vadd.f32 %v705_v0, %v704_v62 }
  0x77   : > { %1014 = vperm.xlu1 %2256, %v991_v48  }
  0x7b   : > { %1019 = vperm.xlu1 %2256, %v992_v54  }
  0x7f   : > { %1024 = vperm.xlu1 %2256, %v993_v57  }
  0x83   : > { %1029 = vperm.xlu1 %2256, %v994_v63  }
  0x87   : > { %1034 = vperm.xlu1 %2256, %v995_v5  }
  0x89   : > { %707 = vadd.xlane.f32.xlu0 %v706_v1 }
  0x8b   : > { %1039 = vperm.xlu1 %2256, %v996_v16  }
  0x8d   : > { %1219 = vmax.xlane.f32.xlu0 %v1218_v13 }
  0x8f   : > { %1044 = vperm.xlu1 %2256, %v997_v19  }
  0x93   : > { %1049 = vperm.xlu1 %2256, %v998_v22  }
  0x97   : > { %1054 = vperm.xlu1 %2256, %v999_v25  }
  0x9b   : > { %1059 = vperm.xlu1 %2256, %v1000_v28  }
  0x9f   : > { %1064 = vperm.xlu1 %2256, %v1001_v32  }
  0xa0   : > { %v2760_v43 = vpop.trf.xlu0 }
  0xa3   : > { %1074 = vperm.xlu1 %2256, %v1003_v33  }
  0xa4   : > { %v2768_v31 = vpop.trf.xlu0 }
  0xa5   : > { %3573 = vst [vmem:[#allocation10_spill] sm:$0xff] %v2768_v31 }
  0xa7   : > { %1079 = vperm.xlu1 %2256, %v1004_v36  }
  0xa8   : > { %v2782_v1 = vpop.trf.xlu0 }
  0xa9   : > { %3574 = vst [vmem:[#allocation11_spill] sm:$0xff] %v2782_v1 }
  0xac   : > { %v2786_v28 = vpop.trf.xlu0 }
  0xad   : > { %3575 = vst [vmem:[#allocation12_spill] sm:$0xff] %v2786_v28 }
  0xb3   : > { %v2754_v37 = vpop.xlane.xlu1 %1207 }
  0xb4   : > { %v1254_v39 = vsub.f32 %v2562_v2, %v2754_v37  ;;  %v1255_v42 = vsub.f32 %v2565_v3, %v2754_v37 }
  0xb6   : > { %v1286_v44 = vmul.f32 1.442695, %v1254_v39  ;;  %v1288_v45 = vmul.f32 1.442695, %v1255_v42 }
  0xb7   : > { %v2762_v48 = vpop.xlane.xlu1 %1210 }
  0xb8   : > { %v1256_v49 = vsub.f32 %v2568_v4, %v2762_v48  ;;  %v1257_v50 = vsub.f32 %v2573_v6, %v2762_v48  ;;  %2258 = vpow2.f32 %v1286_v44 }
  0xb9   : > { %2260 = vpow2.f32 %v1288_v45 }
  0xba   : > { %v1290_v51 = vmul.f32 1.442695, %v1256_v49  ;;  %v1292_v54 = vmul.f32 1.442695, %v1257_v50  ;;  %v2792_v49 = vpop.trf.xlu0 }
  0xbb   : > { %v2770_v55 = vpop.xlane.xlu1 %1213  ;;  %3576 = vst [vmem:[#allocation13_spill] sm:$0xff] %v2792_v49 }
  0xbc   : > { %2262 = vpow2.f32 %v1290_v51  ;;  %v1258_v56 = vsub.f32 %v2578_v8, %v2770_v55  ;;  %v1259_v57 = vsub.f32 %v2581_v9, %v2770_v55 }
  0xbd   : > { %2264 = vpow2.f32 %v1292_v54 }
  0xbe   : > { %v1294_v60 = vmul.f32 1.442695, %v1258_v56  ;;  %v1296_v61 = vmul.f32 1.442695, %v1259_v57 }
  0xbf   : > { %v2776_v62 = vpop.xlane.xlu1 %1216 }
  0xc0   : > { %2266 = vpow2.f32 %v1294_v60  ;;  %v1260_v63 = vsub.f32 %v2586_v11, %v2776_v62  ;;  %v1261_v0 = vsub.f32 %v2589_v12, %v2776_v62 }
  0xc1   : > { %2268 = vpow2.f32 %v1296_v61 }
  0xc2   : > { %v1298_v5 = vmul.f32 1.442695, %v1260_v63  ;;  %v1300_v13 = vmul.f32 1.442695, %v1261_v0  ;;  %v2259_v19 = vpop.eup %2258 }
  0xc3   : > { %v2784_v16 = vpop.xlane.xlu1 %1222  ;;  %v2261_v22 = vpop.eup %2260 }
  0xc4   : > { %2270 = vpow2.f32 %v1298_v5  ;;  %v1350_v39 = vadd.f32 %v2261_v22, %v2259_v19  ;;  %v2800_v5 = vpop.trf.xlu0 }
  0xc5   : > { %2272 = vpow2.f32 %v1300_v13  ;;  %3577 = vst [vmem:[#allocation14_spill] sm:$0xff] %v2800_v5 }
  0xc6   : > { %v2263_v25 = vpop.eup %2262 }
  0xc7   : > { %v2265_v32 = vpop.eup %2264  ;;  %v2788_v33 = vpop.xlane.xlu1 %1225 }
  0xc8   : > { %v1353_v36 = vadd.f32 %v2265_v32, %v2263_v25  ;;  %v2806_v22 = vpop.trf.xlu0 }
  0xc9   : > { %3578 = vst [vmem:[#allocation15_spill] sm:$0xff] %v2806_v22 }
  0xca   : > { %v2267_v42 = vpop.eup %2266  ;;  %1354 = vadd.xlane.f32.xlu0 %v1353_v36 }
  0xcb   : > { %v2269_v44 = vpop.eup %2268  ;;  %v2790_v45 = vpop.xlane.xlu1 %1228  ;;  %1351 = vadd.xlane.f32.xlu1 %v1350_v39 }
  0xcc   : > { %v1356_v50 = vadd.f32 %v2269_v44, %v2267_v42  ;;  %v2810_v36 = vpop.trf.xlu0 }
  0xcd   : > { %3579 = vst [vmem:[#allocation16_spill] sm:$0xff] %v2810_v36 }
  0xce   : > { %v2271_v51 = vpop.eup %2270 }
  0xcf   : > { %v2273_v54 = vpop.eup %2272  ;;  %v2794_v56 = vpop.xlane.xlu1 %1231  ;;  %1357 = vadd.xlane.f32.xlu1 %v1356_v50 }
  0xd0   : > { %v1270_v57 = vsub.f32 %v2618_v23, %v2794_v56  ;;  %v1271_v60 = vsub.f32 %v2621_v24, %v2794_v56  ;;  %v1359_v61 = vadd.f32 %v2273_v54, %v2271_v51  ;;  %v2816_v51 = vpop.trf.xlu0 }
  0xd1   : > { %3580 = vst [vmem:[#allocation17_spill] sm:$0xff] %v2816_v51  ;;  %v1130_v51 = vld [vmem:[%s3545_s4] sm:$0x3] }
  0xd2   : > { %v1318_v63 = vmul.f32 1.442695, %v1270_v57  ;;  %v1320_v0 = vmul.f32 1.442695, %v1271_v60  ;;  %v1088_v57 = vlaneseq }
  0xd3   : > { %v2802_v13 = vpop.xlane.xlu1 %1234  ;;  %1360 = vadd.xlane.f32.xlu1 %v1359_v61 }
  0xd4   : > { %2274 = vpow2.f32 %v1318_v63  ;;  %v2820_v60 = vpop.trf.xlu0  ;;  %v1089_v63 = vshrl.u32 %v1088_v57, 7 }
  0xd5   : > { %2276 = vpow2.f32 %v1320_v0  ;;  %3581 = vst [vmem:[#allocation18_spill] sm:$0xff] %v2820_v60 }
  0xd6   : > { %v1090_v5 = vsub.s32 0, %v1089_v63 }
  0xd7   : > { %v2804_v19 = vpop.xlane.xlu1 %1237 }
  0xd8   : > { %v2826_v36 = vpop.trf.xlu0 }
  0xd9   : > { %3583 = vst [vmem:[#allocation20_spill] sm:$0xff] %v2826_v36  ;;  %v2842_v36 = vrot.slane %v1130_v51, %v1090_v5 }
  0xdb   : > { %v2808_v25 = vpop.xlane.xlu1 %1240 }
  0xdc   : > { %v2846_v28 = vpop.trf.xlu0 }
  0xdd   : > { %3585 = vst [vmem:[#allocation21_spill] sm:$0xff] %v2846_v28 }
  0xde   : > { %v2275_v32 = vpop.eup %2274 }
  0xdf   : > { %v2277_v39 = vpop.eup %2276  ;;  %v2812_v42 = vpop.xlane.xlu1 %1243 }
  0xe0   : > { %v1374_v44 = vadd.f32 %v2277_v39, %v2275_v32  ;;  %v1006_v32 = vld [vmem:[%s3584_s3] sm:$0x3]  ;;  %v1094_v39 = vsub.s32 1, %v1089_v63  ;;  %v1278_v57 = vsub.f32 %v2667_v40, %v2812_v42  ;;  %v1279_v63 = vsub.f32 %v2670_v41, %v2812_v42  ;;  %v2859_v1 = vpop.trf.xlu0 }
  0xe1   : > { %v2836_v60 = vrot.slane %v1006_v32, %v1090_v5 }
  0xe2   : > { %1375 = vadd.xlane.f32.xlu0 %v1374_v44  ;;  %v2840_v22 = vrot.slane %v1006_v32, %v1094_v39  ;;  %v2844_v49 = vrot.slane %v1130_v51, %v1094_v39  ;;  %v1334_v32 = vmul.f32 1.442695, %v1278_v57  ;;  %v1336_v51 = vmul.f32 1.442695, %v1279_v63 }
  0xe3   : > { %v2814_v50 = vpop.xlane.xlu1 %1246 }
  0xe4   : > { %2278 = vpow2.f32 %v1334_v32  ;;  %v2869_v57 = vpop.trf.xlu0 }
  0xe5   : > { %2280 = vpow2.f32 %v1336_v51 }
  0xe7   : > { %v2818_v54 = vpop.xlane.xlu1 %1249 }
  0xeb   : > { %v2822_v61 = vpop.xlane.xlu1 %1252 }
  0xee   : > { %v2279_v51 = vpop.eup %2278 }
  0xef   : > { %v2824_v0 = vpop.permute.xlu1 %783 }
  0xf0   : > { %3582 = vst [vmem:[#allocation19_spill] sm:$0xff] %v2824_v0 }
  0xf3   : > { %v2831_v44 = vpop.permute.xlu1 %1009 }
  0xf7   : > { %v1015_v31 = vpop.permute.xlu1 %1014 }
  0xf8   : > { %vm1100_vm1 = vcmp.gt.f32.partialorder %v1015_v31, %v2836_v60  ;;  %vm1101_vm2 = vcmp.gt.f32.partialorder %v1015_v31, %v2840_v22  ;;  %vm1144_vm3 = vcmp.le.f32.partialorder %v1015_v31, %v2842_v36  ;;  %vm1145_vm4 = vcmp.le.f32.partialorder %v1015_v31, %v2844_v49 }
  0xf9   : > { %vm1176_vm5 = vmand %vm1100_vm1, %vm1144_vm3 }
  0xfa   : > { %vm1177_vm6 = vmand %vm1101_vm2, %vm1145_vm4  ;;  %v1448_v5 = vsel %vm1176_vm5, %v2568_v4, 0.0 }
  0xfb   : > { %v1020_v39 = vpop.permute.xlu1 %1019  ;;  %v1449_v28 = vsel %vm1177_vm6, %v2573_v6, 0.0 }
  0xfc   : > { %v1481_v0 = vadd.f32 %v1449_v28, %v1448_v5  ;;  %vm1102_vm7 = vcmp.gt.f32.partialorder %v1020_v39, %v2836_v60  ;;  %vm1103_vm8 = vcmp.gt.f32.partialorder %v1020_v39, %v2840_v22  ;;  %vm1146_vm9 = vcmp.le.f32.partialorder %v1020_v39, %v2842_v36 }
  0xfd   : > { %vm1147_vm10 = vcmp.le.f32.partialorder %v1020_v39, %v2844_v49  ;;  %vm1178_vm11 = vmand %vm1102_vm7, %vm1146_vm9 }
  0xfe   : > { %1482 = vadd.xlane.f32.xlu0 %v1481_v0  ;;  %vm1179_vm12 = vmand %vm1103_vm8, %vm1147_vm10  ;;  %v1450_v4 = vsel %vm1178_vm11, %v2578_v8, 0.0 }
  0xff   : > { %v1025_v31 = vpop.permute.xlu1 %1024  ;;  %v1451_v6 = vsel %vm1179_vm12, %v2581_v9, 0.0 }
 0x100   : > { %v1484_v28 = vadd.f32 %v1451_v6, %v1450_v4  ;;  %vm1104_vm13 = vcmp.gt.f32.partialorder %v1025_v31, %v2836_v60  ;;  %vm1105_vm14 = vcmp.gt.f32.partialorder %v1025_v31, %v2840_v22  ;;  %vm1148_vm15 = vcmp.le.f32.partialorder %v1025_v31, %v2842_v36  ;;  %v2281_v4 = vpop.eup %2280 }
 0x101   : > { %vm1149_vm1 = vcmp.le.f32.partialorder %v1025_v31, %v2844_v49  ;;  %vm1180_vm2 = vmand %vm1104_vm13, %vm1148_vm15  ;;  %v1386_v31 = vadd.f32 %v2281_v4, %v2279_v51 }
 0x102   : > { %1485 = vadd.xlane.f32.xlu0 %v1484_v28  ;;  %vm1181_vm3 = vmand %vm1105_vm14, %vm1149_vm1  ;;  %v1452_v0 = vsel %vm1180_vm2, %v2586_v11, 0.0  ;;  %vm1098_vm1 = vcmp.gt.f32.partialorder %v2831_v44, %v2836_v60  ;;  %vm1142_vm2 = vcmp.le.f32.partialorder %v2831_v44, %v2842_v36 }
 0x103   : > { %v1030_v8 = vpop.permute.xlu1 %1029  ;;  %v1453_v63 = vsel %vm1181_vm3, %v2589_v12, 0.0  ;;  %v2878_v12 = vpop.trf.xlu0  ;;  %vm1099_vm3 = vcmp.gt.f32.partialorder %v2831_v44, %v2840_v22 }
 0x104   : > { %v1487_v9 = vadd.f32 %v1453_v63, %v1452_v0  ;;  %vm1106_vm4 = vcmp.gt.f32.partialorder %v1030_v8, %v2836_v60  ;;  %vm1107_vm5 = vcmp.gt.f32.partialorder %v1030_v8, %v2840_v22  ;;  %vm1150_vm6 = vcmp.le.f32.partialorder %v1030_v8, %v2842_v36  ;;  %3586 = vst [vmem:[#allocation22_spill] sm:$0xff] %v2878_v12 }
 0x105   : > { %vm1151_vm7 = vcmp.le.f32.partialorder %v1030_v8, %v2844_v49  ;;  %vm1182_vm8 = vmand %vm1106_vm4, %vm1150_vm6  ;;  %vm1143_vm4 = vcmp.le.f32.partialorder %v2831_v44, %v2844_v49 }
 0x106   : > { %1488 = vadd.xlane.f32.xlu0 %v1487_v9  ;;  %vm1183_vm9 = vmand %vm1107_vm5, %vm1151_vm7  ;;  %v1454_v32 = vsel %vm1182_vm8, %v2739_v7, 0.0 }
 0x107   : > { %v1035_v11 = vpop.permute.xlu1 %1034  ;;  %v1455_v5 = vsel %vm1183_vm9, %v2742_v10, 0.0  ;;  %v2886_v0 = vpop.trf.xlu0  ;;  %vm2954_vm5 = vmand %vm1098_vm1, %vm1142_vm2 }
 0x108   : > { %v1490_v39 = vadd.f32 %v1455_v5, %v1454_v32  ;;  %vm1108_vm10 = vcmp.gt.f32.partialorder %v1035_v11, %v2836_v60  ;;  %vm1109_vm11 = vcmp.gt.f32.partialorder %v1035_v11, %v2840_v22  ;;  %vm1152_vm12 = vcmp.le.f32.partialorder %v1035_v11, %v2842_v36  ;;  %3587 = vst [vmem:[#allocation23_spill] sm:$0xff] %v2886_v0  ;;  %vm2960_vm6 = vmand %vm1099_vm3, %vm1143_vm4 }
 0x109   : > { %vm1153_vm13 = vcmp.le.f32.partialorder %v1035_v11, %v2844_v49  ;;  %vm1184_vm14 = vmand %vm1108_vm10, %vm1152_vm12  ;;  %v1264_v32 = vsub.f32 %v2594_v14, %v2784_v16  ;;  %v1265_v5 = vsub.f32 %v2597_v15, %v2784_v16 }
 0x10a   : > { %1491 = vadd.xlane.f32.xlu0 %v1490_v39  ;;  %vm1185_vm15 = vmand %vm1109_vm11, %vm1153_vm13  ;;  %v1456_v6 = vsel %vm1184_vm14, %v2594_v14, 0.0 }
 0x10b   : > { %v1457_v28 = vsel %vm1185_vm15, %v2597_v15, 0.0  ;;  %v1267_v15 = vsub.f32 %v2605_v18, %v2788_v33 }
 0x10c   : > { %v1493_v8 = vadd.f32 %v1457_v28, %v1456_v6  ;;  %v1306_v6 = vmul.f32 1.442695, %v1264_v32  ;;  %v1266_v28 = vsub.f32 %v2602_v17, %v2788_v33 }
 0x10e   : > { %1387 = vadd.xlane.f32.xlu0 %v1386_v31 }
 0x112   : > { %1494 = vadd.xlane.f32.xlu0 %v1493_v8 }
 0x116   : > { %v708_v63 = vpop.xlane.xlu0 %707 }
 0x117   : > { %v709_v9 = vrot.slane %v708_v63, 4 }
 0x119   : > { %v710_v11 = vadd.f32 %v709_v9, %v708_v63  ;;  %v1308_v63 = vmul.f32 1.442695, %v1265_v5 }
 0x11a   : > { %v2892_v51 = vpop.xlane.xlu0 %1219 }
 0x11b   : > { %v711_v39 = vrot.slane %v710_v11, 2  ;;  %v1262_v4 = vsub.f32 %v2739_v7, %v2892_v51  ;;  %v1263_v31 = vsub.f32 %v2742_v10, %v2892_v51  ;;  %v1310_v7 = vmul.f32 1.442695, %v1266_v28 }
 0x11c   : > { %v1268_v10 = vsub.f32 %v2610_v20, %v2790_v45 }
 0x11d   : > { %v1302_v8 = vmul.f32 1.442695, %v1262_v4  ;;  %v1304_v0 = vmul.f32 1.442695, %v1263_v31  ;;  %v712_v14 = vadd.f32 %v711_v39, %v710_v11  ;;  %v1312_v11 = vmul.f32 1.442695, %v1267_v15 }
 0x11e   : > { %v1314_v5 = vmul.f32 1.442695, %v1268_v10  ;;  %v1272_v4 = vsub.f32 %v2629_v26, %v2802_v13  ;;  %v1002_v31 = vld [vmem:[%s2720_s30 + $0x60] sm:$0xff]  ;;  %v1274_v10 = vsub.f32 %v2643_v29, %v2804_v19 }
 0x11f   : > { %2282 = vpow2.f32 %v1302_v8  ;;  %v713_v9 = vrot.slane %v712_v14, 1 }
 0x120   : > { %2284 = vpow2.f32 %v1304_v0  ;;  %v1269_v0 = vsub.f32 %v2613_v21, %v2790_v45 }
 0x121   : > { %2286 = vpow2.f32 %v1306_v6  ;;  %v714_v32 = vadd.f32 %v713_v9, %v712_v14  ;;  %v1273_v6 = vsub.f32 %v2632_v27, %v2802_v13 }
 0x122   : > { %2288 = vpow2.f32 %v1308_v63  ;;  %v1316_v39 = vmul.f32 1.442695, %v1269_v0  ;;  %v1322_v63 = vmul.f32 1.442695, %v1272_v4  ;;  %v1326_v4 = vmul.f32 1.442695, %v1274_v10 }
 0x123   : > { %2172 = vpush %v714_v32  ;;  %2290 = vpow2.f32 %v1310_v7  ;;  %v1324_v7 = vmul.f32 1.442695, %v1273_v6  ;;  %v1275_v32 = vsub.f32 %v2646_v30, %v2804_v19 }
 0x124   : > { %2292 = vpow2.f32 %v1312_v11  ;;  %v2937_v11 = vpop.permute.xlu1 %1039 }
 0x125   : > { %2294 = vpow2.f32 %v1314_v5  ;;  %v1328_v6 = vmul.f32 1.442695, %v1275_v32  ;;  %v1281_v32 = vsub.f32 %v2681_v47, %v2814_v50  ;;  %vm1110_vm7 = vcmp.gt.f32.partialorder %v2937_v11, %v2836_v60 }
 0x126   : > { %2296 = vpow2.f32 %v1316_v39  ;;  %vm1154_vm8 = vcmp.le.f32.partialorder %v2937_v11, %v2842_v36  ;;  %vm1111_vm9 = vcmp.gt.f32.partialorder %v2937_v11, %v2840_v22  ;;  %vm1155_vm10 = vcmp.le.f32.partialorder %v2937_v11, %v2844_v49 }
 0x127   : > { %2298 = vpow2.f32 %v1322_v63  ;;  %vm2990_vm11 = vmand %vm1110_vm7, %vm1154_vm8 }
 0x128   : > { %1069 = vperm.xlu0 %2257, %v1002_v31   ;;  %2300 = vpow2.f32 %v1324_v7  ;;  %v1276_v31 = vsub.f32 %v2653_v34, %v2808_v25  ;;  %v2952_v63 = vpop.permute.xlu1 %1044  ;;  %v1280_v7 = vsub.f32 %v2678_v46, %v2814_v50  ;;  %vm2994_vm12 = vmand %vm1111_vm9, %vm1155_vm10 }
 0x129   : > { %v2283_v28 = vpop.eup %2282  ;;  %2302 = vpow2.f32 %v1326_v4  ;;  %vm1112_vm2 = vcmp.gt.f32.partialorder %v2952_v63, %v2836_v60  ;;  %vm1156_vm3 = vcmp.le.f32.partialorder %v2952_v63, %v2842_v36  ;;  %vm1113_vm4 = vcmp.gt.f32.partialorder %v2952_v63, %v2840_v22 }
 0x12a   : > { %v2285_v8 = vpop.eup %2284  ;;  %2304 = vpow2.f32 %v1328_v6  ;;  %vm3028_vm10 = vmand %vm1112_vm2, %vm1156_vm3 }
 0x12b   : > { %v2287_v14 = vpop.eup %2286  ;;  %v1362_v15 = vadd.f32 %v2285_v8, %v2283_v28 }
 0x12c   : > { %v2289_v9 = vpop.eup %2288  ;;  %793 = vperm.xlu0 %2257, %v2662_v38   ;;  %v1277_v38 = vsub.f32 %v2656_v35, %v2808_v25 }
 0x12d   : > { %1363 = vadd.xlane.f32.xlu1 %v1362_v15  ;;  %v2291_v0 = vpop.eup %2290  ;;  %v1365_v5 = vadd.f32 %v2289_v9, %v2287_v14  ;;  %v1330_v9 = vmul.f32 1.442695, %v1276_v31  ;;  %v1338_v31 = vmul.f32 1.442695, %v1280_v7 }
 0x12e   : > { %v2293_v39 = vpop.eup %2292  ;;  %v1332_v44 = vmul.f32 1.442695, %v1277_v38  ;;  %v1340_v38 = vmul.f32 1.442695, %v1281_v32  ;;  %v1285_v32 = vsub.f32 %v2701_v59, %v2822_v61 }
 0x12f   : > { %v2295_v28 = vpop.eup %2294  ;;  %v1368_v8 = vadd.f32 %v2293_v39, %v2291_v0  ;;  %v1447_v39 = vsel %vm2960_vm6, %v2565_v3, 0.0  ;;  %2306 = vpow2.f32 %v1330_v9 }
 0x130   : > { %v2297_v14 = vpop.eup %2296  ;;  %2308 = vpow2.f32 %v1332_v44  ;;  %v1284_v44 = vsub.f32 %v2698_v58, %v2822_v61  ;;  %v1348_v59 = vmul.f32 1.442695, %v1285_v32 }
 0x131   : > { %1366 = vadd.xlane.f32.xlu1 %v1365_v5  ;;  %v1371_v0 = vadd.f32 %v2297_v14, %v2295_v28  ;;  %v1446_v5 = vsel %vm2954_vm5, %v2562_v2, 0.0  ;;  %v2299_v4 = vpop.eup %2298  ;;  %v1283_v28 = vsub.f32 %v2691_v53, %v2818_v54  ;;  %v1050_v14 = vpop.permute.xlu1 %1049  ;;  %2310 = vpow2.f32 %v1338_v31 }
 0x132   : > { %v2301_v6 = vpop.eup %2300  ;;  %v1478_v15 = vadd.f32 %v1447_v39, %v1446_v5  ;;  %2312 = vpow2.f32 %v1340_v38  ;;  %vm1114_vm13 = vcmp.gt.f32.partialorder %v1050_v14, %v2836_v60  ;;  %vm1158_vm14 = vcmp.le.f32.partialorder %v1050_v14, %v2842_v36 }
 0x133   : > { %v1344_v3 = vmul.f32 1.442695, %v1283_v28  ;;  %v2303_v10 = vpop.eup %2302  ;;  %v1377_v9 = vadd.f32 %v2301_v6, %v2299_v4  ;;  %v1346_v4 = vmul.f32 1.442695, %v1284_v44  ;;  %vm1115_vm15 = vcmp.gt.f32.partialorder %v1050_v14, %v2840_v22  ;;  %vm3018_vm6 = vmand %vm1114_vm13, %vm1158_vm14 }
 0x134   : > { %v2305_v7 = vpop.eup %2304  ;;  %vm1159_vm1 = vcmp.le.f32.partialorder %v1050_v14, %v2844_v49  ;;  %v1458_v28 = vsel %vm2990_vm11, %v2602_v17, 0.0  ;;  %vm1157_vm5 = vcmp.le.f32.partialorder %v2952_v63, %v2844_v49  ;;  %v1462_v44 = vsel %vm3018_vm6, %v2618_v23, 0.0 }
 0x135   : > { %1369 = vadd.xlane.f32.xlu1 %v1368_v8  ;;  %v1282_v8 = vsub.f32 %v2688_v52, %v2818_v54  ;;  %v2976_v12 = vpop.permute.xlu1 %1054  ;;  %v1380_v5 = vadd.f32 %v2305_v7, %v2303_v10  ;;  %vm3022_vm7 = vmand %vm1115_vm15, %vm1159_vm1  ;;  %v1460_v23 = vsel %vm3028_vm10, %v2610_v20, 0.0 }
 0x136   : > { %vm3037_vm13 = vmand %vm1113_vm4, %vm1157_vm5  ;;  %v1463_v32 = vsel %vm3022_vm7, %v2621_v24, 0.0  ;;  %vm1116_vm1 = vcmp.gt.f32.partialorder %v2976_v12, %v2836_v60  ;;  %vm1160_vm2 = vcmp.le.f32.partialorder %v2976_v12, %v2842_v36  ;;  %vm1117_vm3 = vcmp.gt.f32.partialorder %v2976_v12, %v2840_v22 }
 0x137   : > { %v1342_v2 = vmul.f32 1.442695, %v1282_v8  ;;  %v1461_v24 = vsel %vm3037_vm13, %v2613_v21, 0.0  ;;  %vm1161_vm4 = vcmp.le.f32.partialorder %v2976_v12, %v2844_v49  ;;  %vm3077_vm5 = vmand %vm1116_vm1, %vm1160_vm2 }
 0x138   : > { %v1499_v21 = vadd.f32 %v1461_v24, %v1460_v23  ;;  %vm3081_vm6 = vmand %vm1117_vm3, %vm1161_vm4 }
 0x139   : > { %1372 = vadd.xlane.f32.xlu1 %v1371_v0  ;;  %2314 = vpow2.f32 %v1342_v2  ;;  %v2307_v0 = vpop.eup %2306  ;;  %v1060_v8 = vpop.permute.xlu1 %1059 }
 0x13a   : > { %2316 = vpow2.f32 %v1344_v3  ;;  %v2309_v58 = vpop.eup %2308  ;;  %vm1118_vm8 = vcmp.gt.f32.partialorder %v1060_v8, %v2836_v60  ;;  %vm1162_vm9 = vcmp.le.f32.partialorder %v1060_v8, %v2842_v36  ;;  %vm1119_vm11 = vcmp.gt.f32.partialorder %v1060_v8, %v2840_v22 }
 0x13b   : > { %v2311_v11 = vpop.eup %2310  ;;  %v1383_v6 = vadd.f32 %v2309_v58, %v2307_v0  ;;  %2318 = vpow2.f32 %v1346_v4  ;;  %vm3047_vm14 = vmand %vm1118_vm8, %vm1162_vm9  ;;  %v1502_v58 = vadd.f32 %v1463_v32, %v1462_v44 }
 0x13c   : > { %v2313_v38 = vpop.eup %2312  ;;  %2320 = vpow2.f32 %v1348_v59  ;;  %v1466_v4 = vsel %vm3047_vm14, %v2643_v29, 0.0 }
 0x13d   : > { %1479 = vadd.xlane.f32.xlu1 %v1478_v15  ;;  %v1459_v15 = vsel %vm2994_vm12, %v2605_v18, 0.0  ;;  %vm1163_vm12 = vcmp.le.f32.partialorder %v1060_v8, %v2844_v49  ;;  %v1389_v10 = vadd.f32 %v2313_v38, %v2311_v11  ;;  %v1065_v39 = vpop.permute.xlu1 %1064  ;;  %v1465_v38 = vsel %vm3081_vm6, %v2632_v27, 0.0 }
 0x13e   : > { %v1496_v3 = vadd.f32 %v1459_v15, %v1458_v28  ;;  %vm3051_vm15 = vmand %vm1119_vm11, %vm1163_vm12  ;;  %vm1120_vm7 = vcmp.gt.f32.partialorder %v1065_v39, %v2836_v60  ;;  %vm1164_vm8 = vcmp.le.f32.partialorder %v1065_v39, %v2842_v36  ;;  %vm1121_vm9 = vcmp.gt.f32.partialorder %v1065_v39, %v2840_v22 }
 0x13f   : > { %v1467_v31 = vsel %vm3051_vm15, %v2646_v30, 0.0  ;;  %vm1165_vm10 = vcmp.le.f32.partialorder %v1065_v39, %v2844_v49  ;;  %vm1196_vm11 = vmand %vm1120_vm7, %vm1164_vm8 }
 0x140   : > { %v1508_v29 = vadd.f32 %v1467_v31, %v1466_v4  ;;  %vm1197_vm12 = vmand %vm1121_vm9, %vm1165_vm10  ;;  %v1468_v15 = vsel %vm1196_vm11, %v2653_v34, 0.0 }
 0x141   : > { %1378 = vadd.xlane.f32.xlu1 %v1377_v9  ;;  %v1075_v12 = vpop.permute.xlu1 %1074 }
 0x142   : > { %vm1124_vm13 = vcmp.gt.f32.partialorder %v1075_v12, %v2836_v60  ;;  %vm1168_vm14 = vcmp.le.f32.partialorder %v1075_v12, %v2842_v36  ;;  %vm1125_vm15 = vcmp.gt.f32.partialorder %v1075_v12, %v2840_v22  ;;  %vm1169_vm1 = vcmp.le.f32.partialorder %v1075_v12, %v2844_v49 }
 0x143   : > { %v2315_v14 = vpop.eup %2314  ;;  %vm1200_vm2 = vmand %vm1124_vm13, %vm1168_vm14 }
 0x144   : > { %v2317_v7 = vpop.eup %2316  ;;  %vm1201_vm3 = vmand %vm1125_vm15, %vm1169_vm1  ;;  %v1472_v2 = vsel %vm1200_vm2, %v2678_v46, 0.0 }
 0x145   : > { %1381 = vadd.xlane.f32.xlu1 %v1380_v5  ;;  %v1392_v5 = vadd.f32 %v2317_v7, %v2315_v14  ;;  %v2319_v20 = vpop.eup %2318  ;;  %v1473_v17 = vsel %vm1201_vm3, %v2681_v47, 0.0  ;;  %v1080_v14 = vpop.permute.xlu1 %1079 }
 0x146   : > { %v2321_v59 = vpop.eup %2320  ;;  %v1517_v18 = vadd.f32 %v1473_v17, %v1472_v2  ;;  %vm1126_vm4 = vcmp.gt.f32.partialorder %v1080_v14, %v2836_v60  ;;  %vm1127_vm6 = vcmp.gt.f32.partialorder %v1080_v14, %v2840_v22  ;;  %vm1171_vm7 = vcmp.le.f32.partialorder %v1080_v14, %v2844_v49  ;;  %v2354_v17 = vld [vmem:[%s2640_s27 + $0x8] sm:$0xff] }
 0x147   : > { %v1395_v11 = vadd.f32 %v2321_v59, %v2319_v20  ;;  %vm1203_vm13 = vmand %vm1127_vm6, %vm1171_vm7  ;;  %vm1615_vm7 = vcmask 64512  }
 0x149   : > { %1384 = vadd.xlane.f32.xlu1 %v1383_v6  ;;  %v1464_v6 = vsel %vm3077_vm5, %v2629_v26, 0.0  ;;  %v1469_v26 = vsel %vm1197_vm12, %v2656_v35, 0.0  ;;  %vm1170_vm5 = vcmp.le.f32.partialorder %v1080_v14, %v2842_v36 }
 0x14a   : > { %v1505_v28 = vadd.f32 %v1465_v38, %v1464_v6  ;;  %v1511_v27 = vadd.f32 %v1469_v26, %v1468_v15  ;;  %vm1202_vm8 = vmand %vm1126_vm4, %vm1170_vm5 }
 0x14b   : > { %1497 = vadd.xlane.f32.xlu0 %v1496_v3 }
 0x14d   : > { %1390 = vadd.xlane.f32.xlu1 %v1389_v10 }
 0x14f   : > { %1393 = vadd.xlane.f32.xlu0 %v1392_v5 }
 0x151   : > { %1503 = vadd.xlane.f32.xlu1 %v1502_v58 }
 0x153   : > { %1500 = vadd.xlane.f32.xlu0 %v1499_v21  ;;  %v1474_v21 = vsel %vm1202_vm8, %v2688_v52, 0.0 }
 0x154   : > { %s2173_s26 = spop %2172 }
 0x155   : > { %1509 = vadd.xlane.f32.xlu1 %v1508_v29  ;;  %s1844_s28 = sadd.f32 %s2173_s26, %s3055_s24  ;;  %v1475_v29 = vsel %vm1203_vm13, %v2691_v53, 0.0  ;;  %s2159_s24 = sld [smem:[#allocation2 + $0x2]] }
 0x156   : > { %v1520_v59 = vadd.f32 %v1475_v29, %v1474_v21 }
 0x157   : > { %1846 = sst [smem:[#allocation2 + $0x5]] %s1844_s28  ;;  %1396 = vadd.xlane.f32.xlu0 %v1395_v11  ;;  %v1355_v10 = vpop.xlane.xlu0 %1354  ;;  %s2160_s28 = sld [smem:[#allocation2 + $0x3]] }
 0x158   : > { %v1352_v3 = vpop.xlane.xlu1 %1351  ;;  %2322 = vlog2.f32 %v1355_v10  ;;  %s2163_s23 = sld [smem:[#allocation2 + $0x5]] (!%p3497_p13) }
 0x15b   : > { %1506 = vadd.xlane.f32.xlu0 %v1505_v28 }
 0x15c   : > { %v1358_v9 = vpop.xlane.xlu1 %1357 }
 0x15d   : > { %2324 = vlog2.f32 %v1358_v9 }
 0x15e   : > { %2326 = vlog2.f32 %v1352_v3 }
 0x15f   : > { %1512 = vadd.xlane.f32.xlu0 %v1511_v27 }
 0x160   : > { %v1361_v30 = vpop.xlane.xlu1 %1360 }
 0x161   : > { %2328 = vlog2.f32 %v1361_v30  ;;  %v2360_v30 = vld [vmem:[%s2640_s27 + $0x30] sm:$0xff] }
 0x162   : > { %v2323_v34 = vpop.eup %2322 }
 0x163   : > { %1518 = vadd.xlane.f32.xlu0 %v1517_v18  ;;  %v1401_v7 = vmul.f32 0.6931472, %v2323_v34 }
 0x165   : > { %v1431_v0 = vadd.f32 %v1401_v7, %v2762_v48 }
 0x167   : > { %v2325_v35 = vpop.eup %2324 }
 0x168   : > { %v1403_v32 = vmul.f32 0.6931472, %v2325_v35  ;;  %v2355_v35 = vld [vmem:[%s2640_s27 + $0x10] sm:$0xff] }
 0x16a   : > { %v1432_v47 = vadd.f32 %v1403_v32, %v2770_v55  ;;  %v2356_v32 = vld [vmem:[%s2640_s27 + $0x18] sm:$0xff] }
 0x16f   : > { %v3104_v44 = vpop.xlane.xlu0 %1375 }
 0x18b   : > { %v1483_v46 = vpop.xlane.xlu0 %1482 }
 0x18c   : > { %v1527_v63 = vsub.f32 %v1431_v0, %v1483_v46  ;;  %v2357_v0 = vld [vmem:[%s2640_s27] sm:$0xff] }
 0x18e   : > { %v1543_v9 = vmul.f32 %v2354_v17, %v1527_v63 }
 0x18f   : > { %v1486_v5 = vpop.xlane.xlu0 %1485 }
 0x190   : > { %v1528_v58 = vsub.f32 %v1432_v47, %v1486_v5  ;;  %v1559_v63 = vsel %vm675_vm0, %v1543_v9, 0.0 }
 0x193   : > { %v3108_v39 = vpop.xlane.xlu0 %1488 }
 0x197   : > { %v3110_v23 = vpop.xlane.xlu0 %1491 }
 0x19b   : > { %v3112_v24 = vpop.xlane.xlu0 %1387 }
 0x19f   : > { %v3114_v4 = vpop.xlane.xlu0 %1494 }
 0x1a7   : > { %v1070_v48 = vpop.permute.xlu0 %1069 }
 0x1a8   : > { %vm1122_vm9 = vcmp.gt.f32.partialorder %v1070_v48, %v2836_v60  ;;  %vm1123_vm10 = vcmp.gt.f32.partialorder %v1070_v48, %v2840_v22  ;;  %vm1166_vm11 = vcmp.le.f32.partialorder %v1070_v48, %v2842_v36  ;;  %vm1167_vm12 = vcmp.le.f32.partialorder %v1070_v48, %v2844_v49 }
 0x1a9   : > { %vm1198_vm14 = vmand %vm1122_vm9, %vm1166_vm11 }
 0x1aa   : > { %vm1199_vm15 = vmand %vm1123_vm10, %vm1167_vm12  ;;  %v1470_v55 = vsel %vm1198_vm14, %v2667_v40, 0.0  ;;  %v2327_v40 = vpop.eup %2326 }
 0x1ab   : > { %v1471_v31 = vsel %vm1199_vm15, %v2670_v41, 0.0  ;;  %v2329_v11 = vpop.eup %2328  ;;  %v1005_v41 = vld [vmem:[%s2720_s30 + $0x78] sm:$0xff]  ;;  %v1399_v28 = vmul.f32 0.6931472, %v2327_v40  ;;  %v3152_v40 = vpop.permute.xlu0 %793 }
 0x1ac   : > { %v1514_v20 = vadd.f32 %v1471_v31, %v1470_v55  ;;  %v1405_v52 = vmul.f32 0.6931472, %v2329_v11 }
 0x1ad   : > { %v1430_v18 = vadd.f32 %v1399_v28, %v2754_v37 }
 0x1ae   : > { %1515 = vadd.xlane.f32.xlu1 %v1514_v20  ;;  %v1433_v2 = vadd.f32 %v1405_v52, %v2776_v62  ;;  %v1544_v62 = vmul.f32 %v2355_v35, %v1528_v58  ;;  %v2361_v52 = vld [vmem:[%s2640_s27 + $0x40] sm:$0xff] }
 0x1b0   : > { %v1529_v34 = vsub.f32 %v1433_v2, %v3108_v39 }
 0x1b2   : > { %1521 = vadd.xlane.f32.xlu1 %v1520_v59  ;;  %v1545_v5 = vmul.f32 %v2356_v32, %v1529_v34 }
 0x1b4   : > { %v1563_v20 = vsel %vm675_vm0, %v1545_v5, 0.0 }
 0x1ba   : > { %v1364_v8 = vpop.xlane.xlu1 %1363 }
 0x1bb   : > { %2330 = vlog2.f32 %v1364_v8 }
 0x1be   : > { %v1367_v12 = vpop.xlane.xlu1 %1366 }
 0x1bf   : > { %2332 = vlog2.f32 %v1367_v12 }
 0x1c2   : > { %v1370_v6 = vpop.xlane.xlu1 %1369 }
 0x1c3   : > { %1084 = vperm.xlu1 %2256, %v1005_v41   ;;  %2334 = vlog2.f32 %v1370_v6 }
 0x1c4   : > { %2336 = vlog2.f32 %v3104_v44 }
 0x1c5   : > { %v2331_v38 = vpop.eup %2330 }
 0x1c6   : > { %v1407_v53 = vmul.f32 0.6931472, %v2331_v38  ;;  %v1373_v15 = vpop.xlane.xlu1 %1372 }
 0x1c7   : > { %788 = vperm.xlu1 %2256, %v2354_v17   ;;  %2338 = vlog2.f32 %v1373_v15 }
 0x1c8   : > { %v1434_v26 = vadd.f32 %v1407_v53, %v2892_v51 }
 0x1c9   : > { %v2333_v27 = vpop.eup %2332 }
 0x1ca   : > { %v1530_v14 = vsub.f32 %v1434_v26, %v3110_v23  ;;  %v1409_v3 = vmul.f32 0.6931472, %v2333_v27  ;;  %v1480_v10 = vpop.xlane.xlu1 %1479  ;;  %v2358_v23 = vld [vmem:[%s2640_s27 + $0x20] sm:$0xff] }
 0x1cb   : > { %v1526_v7 = vsub.f32 %v1430_v18, %v1480_v10  ;;  %798 = vperm.xlu1 %2256, %v2356_v32  }
 0x1cc   : > { %v1435_v51 = vadd.f32 %v1409_v3, %v2784_v16  ;;  %v1561_v16 = vsel %vm675_vm0, %v1544_v62, 0.0  ;;  %v1546_v58 = vmul.f32 %v2358_v23, %v1530_v14  ;;  %v2362_v14 = vld [vmem:[%s2640_s27 + $0x50] sm:$0xff]  ;;  %v2363_v62 = vld [vmem:[%s2640_s27 + $0x60] sm:$0xff] }
 0x1cd   : > { %v1542_v46 = vmul.f32 %v2357_v0, %v1526_v7  ;;  %v2335_v48 = vpop.eup %2334 }
 0x1ce   : > { %v1531_v37 = vsub.f32 %v1435_v51, %v3114_v4  ;;  %v1379_v47 = vpop.xlane.xlu1 %1378  ;;  %v3147_v4 = vld [vmem:[%s2640_s27 + $0x28] sm:$0xff]  ;;  %v1411_v59 = vmul.f32 0.6931472, %v2335_v48  ;;  %v1565_v8 = vsel %vm675_vm0, %v1546_v58, 0.0  ;;  %v2337_v12 = vpop.eup %2336 }
 0x1cf   : > { %v1558_v39 = vsel %vm675_vm0, %v1542_v46, 0.0  ;;  %803 = vperm.xlu1 %2256, %v2358_v23   ;;  %v1415_v28 = vmul.f32 0.6931472, %v2337_v12 }
 0x1d0   : > { %v1560_v44 = vadd.f32 %v1559_v63, %v1558_v39  ;;  %v1547_v21 = vmul.f32 %v3147_v4, %v1531_v37  ;;  %v1436_v53 = vadd.f32 %v1411_v59, %v2788_v33  ;;  %v2365_v39 = vld [vmem:[%s2640_s27 + $0x68] sm:$0xff] }
 0x1d1   : > { %v2339_v15 = vpop.eup %2338  ;;  %v1438_v3 = vadd.f32 %v1415_v28, %v2794_v56  ;;  %v3163_v56 = vld [vmem:[%s2640_s27 + $0x38] sm:$0xff] }
 0x1d2   : > { %v1562_v55 = vadd.f32 %v1561_v16, %v1560_v44  ;;  %v1382_v31 = vpop.xlane.xlu1 %1381  ;;  %v1567_v6 = vsel %vm675_vm0, %v1547_v21, 0.0  ;;  %v1413_v17 = vmul.f32 0.6931472, %v2339_v15 }
 0x1d3   : > { %2340 = vlog2.f32 %v1382_v31  ;;  %813 = vperm.xlu1 %2256, %v2360_v30  }
 0x1d4   : > { %v1564_v29 = vadd.f32 %v1563_v20, %v1562_v55  ;;  %2342 = vlog2.f32 %v1379_v47  ;;  %v1437_v32 = vadd.f32 %v1413_v17, %v2790_v45 }
 0x1d6   : > { %v1566_v11 = vadd.f32 %v1565_v8, %v1564_v29  ;;  %v1385_v41 = vpop.xlane.xlu1 %1384 }
 0x1d7   : > { %823 = vperm.xlu1 %2256, %v2361_v52   ;;  %2344 = vlog2.f32 %v1385_v41 }
 0x1d8   : > { %v1568_v38 = vadd.f32 %v1567_v6, %v1566_v11  ;;  %v1498_v26 = vpop.xlane.xlu0 %1497 }
 0x1d9   : > { %v1532_v2 = vsub.f32 %v1436_v53, %v1498_v26  ;;  %v3181_v53 = vld [vmem:[%s2640_s27 + $0x58] sm:$0xff] }
 0x1da   : > { %v1391_v27 = vpop.xlane.xlu1 %1390 }
 0x1db   : > { %v1548_v18 = vmul.f32 %v2360_v30, %v1532_v2  ;;  %833 = vperm.xlu1 %2256, %v2362_v14   ;;  %2346 = vlog2.f32 %v1391_v27 }
 0x1dc   : > { %v1394_v9 = vpop.xlane.xlu0 %1393  ;;  %2348 = vlog2.f32 %v3112_v24 }
 0x1dd   : > { %v2341_v10 = vpop.eup %2340  ;;  %v1569_v7 = vsel %vm675_vm0, %v1548_v18, 0.0  ;;  %2350 = vlog2.f32 %v1394_v9 }
 0x1de   : > { %v1504_v34 = vpop.xlane.xlu1 %1503  ;;  %v1570_v51 = vadd.f32 %v1569_v7, %v1568_v38  ;;  %v1419_v35 = vmul.f32 0.6931472, %v2341_v10  ;;  %v2343_v0 = vpop.eup %2342 }
 0x1df   : > { %v1534_v33 = vsub.f32 %v1438_v3, %v1504_v34  ;;  %843 = vperm.xlu1 %2256, %v2363_v62   ;;  %v1417_v63 = vmul.f32 0.6931472, %v2343_v0 }
 0x1e0   : > { %v1501_v46 = vpop.xlane.xlu0 %1500  ;;  %v1440_v44 = vadd.f32 %v1419_v35, %v2804_v19  ;;  %v3174_v19 = vld [vmem:[%s2640_s27 + $0x48] sm:$0xff] }
 0x1e1   : > { %v1533_v37 = vsub.f32 %v1437_v32, %v1501_v46  ;;  %v1550_v47 = vmul.f32 %v2361_v52, %v1534_v33  ;;  %v2345_v16 = vpop.eup %2344  ;;  %v1439_v21 = vadd.f32 %v1417_v63, %v2802_v13 }
 0x1e2   : > { %v1510_v58 = vpop.xlane.xlu1 %1509  ;;  %v1421_v31 = vmul.f32 0.6931472, %v2345_v16 }
 0x1e3   : > { %v1549_v5 = vmul.f32 %v3163_v56, %v1533_v37  ;;  %848 = vperm.xlu1 %2256, %v2365_v39   ;;  %v1573_v48 = vsel %vm675_vm0, %v1550_v47, 0.0  ;;  %v1536_v20 = vsub.f32 %v1440_v44, %v1510_v58  ;;  %v718_v47 = vld [vmem:[%s3196_s19 + $0x10] sm:$0xff] }
 0x1e4   : > { %v3168_v23 = vpop.xlane.xlu0 %1396  ;;  %v1441_v11 = vadd.f32 %v1421_v31, %v2808_v25  ;;  %v893_v25 = vld [vmem:[%s605_s17] sm:$0xff] }
 0x1e5   : > { %v1571_v45 = vsel %vm675_vm0, %v1549_v5, 0.0  ;;  %v1552_v8 = vmul.f32 %v2362_v14, %v1536_v20  ;;  %v2347_v17 = vpop.eup %2346  ;;  %2352 = vlog2.f32 %v3168_v23 }
 0x1e6   : > { %v1572_v55 = vadd.f32 %v1571_v45, %v1570_v51  ;;  %v2349_v18 = vpop.eup %2348  ;;  %v1425_v14 = vmul.f32 0.6931472, %v2347_v17  ;;  %v716_v51 = vld [vmem:[%s3196_s19] sm:$0xff] }
 0x1e7   : > { %v1577_v52 = vsel %vm675_vm0, %v1552_v8, 0.0  ;;  %v1423_v3 = vmul.f32 0.6931472, %v2349_v18  ;;  %v2351_v10 = vpop.eup %2350  ;;  %v765_v46 = vsub.f32 %v716_v51, %v2760_v43 }
 0x1e8   : > { %v1574_v29 = vadd.f32 %v1573_v48, %v1572_v55  ;;  %v1507_v59 = vpop.xlane.xlu0 %1506  ;;  %v1443_v7 = vadd.f32 %v1425_v14, %v2814_v50  ;;  %v1427_v33 = vmul.f32 0.6931472, %v2351_v10 }
 0x1e9   : > { %v1535_v30 = vsub.f32 %v1439_v21, %v1507_v59  ;;  %v1442_v24 = vadd.f32 %v1423_v3, %v2812_v42  ;;  %v3206_v42 = vld [vmem:[%s2640_s27 + $0x70] sm:$0xff]  ;;  %v3617_v21 = vld [vmem:[#allocation10_spill] sm:$0xff]  ;;  %v719_v59 = vld [vmem:[%s3196_s19 + $0x18] sm:$0xff] }
 0x1ea   : > { %v1444_v50 = vadd.f32 %v1427_v33, %v2818_v54  ;;  %v3614_v54 = vld [vmem:[#allocation19_spill] sm:$0xff] }
 0x1eb   : > { %v1551_v12 = vmul.f32 %v3174_v19, %v1535_v30  ;;  %v861_v48 = vmul.f32 %v3614_v54, %v765_v46 }
 0x1ec   : > { %v1513_v41 = vpop.xlane.xlu0 %1512 }
 0x1ed   : > { %v1575_v6 = vsel %vm675_vm0, %v1551_v12, 0.0  ;;  %v1537_v38 = vsub.f32 %v1441_v11, %v1513_v41  ;;  %v2370_v12 = vld [vmem:[%s2559_s12 + $0xf8] sm:$0xff]  ;;  %v1660_v41 = vmul.f32 %v861_v48, %v861_v48 }
 0x1ee   : > { %v1576_v28 = vadd.f32 %v1575_v6, %v1574_v29 }
 0x1ef   : > { %v1553_v13 = vmul.f32 %v3181_v53, %v1537_v38  ;;  %v1676_v14 = vsel %vm1615_vm7, %v1660_v41, 0.0 }
 0x1f0   : > { %v1578_v15 = vadd.f32 %v1577_v52, %v1576_v28  ;;  %v1519_v34 = vpop.xlane.xlu0 %1518  ;;  %v3618_v28 = vld [vmem:[#allocation12_spill] sm:$0xff] }
 0x1f1   : > { %v1579_v26 = vsel %vm675_vm0, %v1553_v13, 0.0  ;;  %v1539_v27 = vsub.f32 %v1443_v7, %v1519_v34  ;;  %v768_v52 = vsub.f32 %v719_v59, %v3618_v28  ;;  %v720_v13 = vld [vmem:[%s3196_s19 + $0x20] sm:$0xff]  ;;  %v3619_v7 = vld [vmem:[#allocation13_spill] sm:$0xff] }
 0x1f2   : > { %v1580_v2 = vadd.f32 %v1579_v26, %v1578_v15  ;;  %v769_v33 = vsub.f32 %v720_v13, %v3619_v7 }
 0x1f3   : > { %v1555_v32 = vmul.f32 %v2365_v39, %v1539_v27  ;;  %v717_v39 = vld [vmem:[%s3196_s19 + $0x8] sm:$0xff] }
 0x1f4   : > { %v766_v29 = vsub.f32 %v717_v39, %v3617_v21 }
 0x1f5   : > { %v1583_v16 = vsel %vm675_vm0, %v1555_v32, 0.0 }
 0x20c   : > { %894 = vxpose.xlu1.b32.start.end [1/1] (short) %v893_v25, 128 }
 0x23b   : > { %v1516_v9 = vpop.xlane.xlu1 %1515 }
 0x23c   : > { %v1538_v35 = vsub.f32 %v1442_v24, %v1516_v9 }
 0x23e   : > { %v1554_v0 = vmul.f32 %v2363_v62, %v1538_v35  ;;  %v3613_v62 = vld [vmem:[#allocation11_spill] sm:$0xff] }
 0x23f   : > { %v1522_v37 = vpop.xlane.xlu1 %1521  ;;  %v767_v45 = vsub.f32 %v718_v47, %v3613_v62 }
 0x240   : > { %v1581_v63 = vsel %vm675_vm0, %v1554_v0, 0.0  ;;  %v1540_v5 = vsub.f32 %v1444_v50, %v1522_v37 }
 0x241   : > { %v1582_v44 = vadd.f32 %v1581_v63, %v1580_v2  ;;  %v863_v30 = vmul.f32 %v3152_v40, %v767_v45 }
 0x242   : > { %v1556_v58 = vmul.f32 %v3206_v42, %v1540_v5 }
 0x243   : > { %v1085_v43 = vpop.permute.xlu1 %1084  ;;  %v1584_v55 = vadd.f32 %v1583_v16, %v1582_v44  ;;  %v1601_v15 = vand.u32 2147483647, %v863_v30  ;;  %v1662_v26 = vmul.f32 %v863_v30, %v863_v30 }
 0x244   : > { %vm1128_vm1 = vcmp.gt.f32.partialorder %v1085_v43, %v2836_v60  ;;  %vm1129_vm2 = vcmp.gt.f32.partialorder %v1085_v43, %v2840_v22  ;;  %vm1172_vm3 = vcmp.le.f32.partialorder %v1085_v43, %v2842_v36  ;;  %vm1173_vm4 = vcmp.le.f32.partialorder %v1085_v43, %v2844_v49  ;;  %v2369_v60 = vld [vmem:[%s2559_s12 + $0xf0] sm:$0xff] }
 0x245   : > { %vm3216_vm5 = vmand %vm1128_vm1, %vm1172_vm3  ;;  %v1585_v20 = vsel %vm675_vm0, %v1556_v58, 0.0  ;;  %v1599_v49 = vand.u32 2147483647, %v861_v48  ;;  %v1619_v9 = vsel %vm1615_vm7, %v1601_v15, 0.0  ;;  %v1679_v51 = vsel %vm1615_vm7, %v1662_v26, 0.0 }
 0x246   : > { %vm1205_vm6 = vmand %vm1129_vm2, %vm1173_vm4  ;;  %v1476_v22 = vsel %vm3216_vm5, %v2369_v60, 0.0  ;;  %v3227_v36 = vadd.f32 %v1585_v20, %v1584_v55  ;;  %v3261_v55 = vld [vmem:[%s2640_s27 + $0x78] sm:$0xff]  ;;  %v879_v60 = vld [vmem:[%s3276_s20 + $0x10] sm:$0xff] }
 0x247   : > { %v789_v8 = vpop.permute.xlu1 %788  ;;  %v1477_v11 = vsel %vm1205_vm6, %v2370_v12, 0.0  ;;  %v1616_v17 = vsel %vm1615_vm7, %v1599_v49, 0.0 }
 0x248   : > { %v862_v6 = vmul.f32 %v789_v8, %v766_v29  ;;  %v1523_v38 = vadd.f32 %v1477_v11, %v1476_v22 }
 0x24a   : > { %v1600_v2 = vand.u32 2147483647, %v862_v6  ;;  %v1661_v25 = vmul.f32 %v862_v6, %v862_v6  ;;  %1524 = vadd.xlane.f32.xlu0 %v1523_v38  ;;  %v880_v38 = vld [vmem:[%s3276_s20 + $0x18] sm:$0xff] }
 0x24b   : > { %v3233_v18 = vpop.permute.xlu1 %798 }
 0x24c   : > { %v1617_v3 = vsel %vm1615_vm7, %v1600_v2, 0.0  ;;  %v1677_v10 = vsel %vm1615_vm7, %v1661_v25, 0.0  ;;  %v864_v34 = vmul.f32 %v3233_v18, %v768_v52 }
 0x24d   : > { %v1618_v27 = vadd.f32 %v1617_v3, %v1616_v17  ;;  %v1678_v24 = vadd.f32 %v1677_v10, %v1676_v14  ;;  %v881_v17 = vld [vmem:[%s3276_s20 + $0x20] sm:$0xff] }
 0x24e   : > { %v1602_v35 = vand.u32 2147483647, %v864_v34  ;;  %v1663_v32 = vmul.f32 %v864_v34, %v864_v34 }
 0x24f   : > { %v1620_v0 = vadd.f32 %v1619_v9, %v1618_v27  ;;  %v1680_v50 = vadd.f32 %v1679_v51, %v1678_v24  ;;  %v3242_v46 = vpop.permute.xlu1 %803 }
 0x250   : > { %v1621_v37 = vsel %vm1615_vm7, %v1602_v35, 0.0  ;;  %v1681_v47 = vsel %vm1615_vm7, %v1663_v32, 0.0  ;;  %v865_v63 = vmul.f32 %v3242_v46, %v769_v33 }
 0x251   : > { %v1622_v5 = vadd.f32 %v1621_v37, %v1620_v0  ;;  %v1682_v44 = vadd.f32 %v1681_v47, %v1680_v50 }
 0x252   : > { %v1603_v16 = vand.u32 2147483647, %v865_v63  ;;  %v1664_v58 = vmul.f32 %v865_v63, %v865_v63 }
 0x253   : > { %v3257_v43 = vpop.permute.xlu1 %813 }
 0x254   : > { %v1623_v39 = vsel %vm1615_vm7, %v1603_v16, 0.0  ;;  %v1683_v62 = vsel %vm1615_vm7, %v1664_v58, 0.0 }
 0x255   : > { %v3249_v45 = vadd.f32 %v1623_v39, %v1622_v5  ;;  %v3251_v48 = vadd.f32 %v1683_v62, %v1682_v44 }
 0x257   : > { %v3264_v31 = vpop.permute.xlu1 %823 }
 0x25b   : > { %v3266_v20 = vpop.permute.xlu1 %833 }
 0x25f   : > { %v3268_v21 = vpop.permute.xlu1 %843 }
 0x260   : > { %808 = vperm.xlu0 %2257, %v3147_v4  }
 0x263   : > { %v3270_v4 = vpop.permute.xlu1 %848 }
 0x264   : > { %818 = vperm.xlu0 %2257, %v3163_v56   ;;  %v877_v56 = vld [vmem:[%s3276_s20] sm:$0xff] }
 0x268   : > { %828 = vperm.xlu0 %2257, %v3174_v19  }
 0x26c   : > { %838 = vperm.xlu0 %2257, %v3181_v53  }
 0x270   : > { %853 = vperm.xlu0 %2257, %v3206_v42   ;;  %v878_v42 = vld [vmem:[%s3276_s20 + $0x8] sm:$0xff] }
 0x274   : > { %858 = vperm.xlu0 %2257, %v3261_v55  }
 0x28c   : > { %v910_v19 = vpop.trf.xlu1 }
 0x28d   : > { %v926_v53 = vsub.f32 %v877_v56, %v910_v19 }
 0x28f   : > { %v942_v30 = vmul.f32 %v926_v53, %v3614_v54 }
 0x290   : > { %v911_v29 = vpop.trf.xlu1 }
 0x291   : > { %v927_v59 = vsub.f32 %v878_v42, %v911_v29  ;;  %v1720_v6 = vand.u32 2147483647, %v942_v30  ;;  %v1780_v28 = vmul.f32 %v942_v30, %v942_v30  ;;  %v722_v42 = vld [vmem:[%s3196_s19 + $0x30] sm:$0xff]  ;;  %v724_v29 = vld [vmem:[%s3196_s19 + $0x40] sm:$0xff] }
 0x293   : > { %v943_v22 = vmul.f32 %v927_v59, %v789_v8  ;;  %v1736_v8 = vsel %vm1615_vm7, %v1720_v6, 0.0  ;;  %v1796_v14 = vsel %vm1615_vm7, %v1780_v28, 0.0  ;;  %v3620_v59 = vld [vmem:[#allocation15_spill] sm:$0xff]  ;;  %v3622_v28 = vld [vmem:[#allocation20_spill] sm:$0xff] }
 0x294   : > { %v912_v49 = vpop.trf.xlu1  ;;  %v771_v30 = vsub.f32 %v722_v42, %v3620_v59  ;;  %v3322_v6 = vld [vmem:[%s3196_s19 + $0x48] sm:$0xff] }
 0x295   : > { %v1721_v12 = vand.u32 2147483647, %v943_v22  ;;  %v1781_v11 = vmul.f32 %v943_v22, %v943_v22  ;;  %v928_v41 = vsub.f32 %v879_v60, %v912_v49  ;;  %v726_v60 = vld [vmem:[%s3196_s19 + $0x50] sm:$0xff]  ;;  %v2353_v22 = vpop.eup %2352  ;;  %v3621_v49 = vld [vmem:[#allocation17_spill] sm:$0xff]  ;;  %v3628_v59 = vld [vmem:[#allocation23_spill] sm:$0xff] }
 0x296   : > { %v867_v23 = vmul.f32 %v3257_v43, %v771_v30 }
 0x297   : > { %v944_v52 = vmul.f32 %v928_v41, %v3152_v40  ;;  %v1737_v13 = vsel %vm1615_vm7, %v1721_v12, 0.0  ;;  %v1797_v26 = vsel %vm1615_vm7, %v1781_v11, 0.0  ;;  %v773_v12 = vsub.f32 %v724_v29, %v3621_v49  ;;  %v3316_v11 = vld [vmem:[%s3196_s19 + $0x28] sm:$0xff]  ;;  %v3319_v41 = vld [vmem:[%s3196_s19 + $0x38] sm:$0xff] }
 0x298   : > { %v913_v15 = vpop.trf.xlu1  ;;  %v1738_v40 = vadd.f32 %v1737_v13, %v1736_v8  ;;  %v1798_v7 = vadd.f32 %v1797_v26, %v1796_v14  ;;  %v728_v13 = vld [vmem:[%s3196_s19 + $0x60] sm:$0xff] }
 0x299   : > { %v1722_v2 = vand.u32 2147483647, %v944_v52  ;;  %v1782_v25 = vmul.f32 %v944_v52, %v944_v52  ;;  %v929_v54 = vsub.f32 %v880_v38, %v913_v15  ;;  %v775_v52 = vsub.f32 %v726_v60, %v3622_v28  ;;  %v729_v15 = vld [vmem:[%s3196_s19 + $0x68] sm:$0xff]  ;;  %v885_v8 = vld [vmem:[%s3276_s20 + $0x40] sm:$0xff] }
 0x29a   : > { %v869_v26 = vmul.f32 %v3264_v31, %v773_v12 }
 0x29b   : > { %v1739_v3 = vsel %vm1615_vm7, %v1722_v2, 0.0  ;;  %v1799_v10 = vsel %vm1615_vm7, %v1782_v25, 0.0  ;;  %v945_v34 = vmul.f32 %v929_v54, %v3233_v18  ;;  %v883_v2 = vld [vmem:[%s3276_s20 + $0x30] sm:$0xff]  ;;  %v3333_v25 = vld [vmem:[%s3196_s19 + $0x58] sm:$0xff]  ;;  %v1429_v54 = vmul.f32 0.6931472, %v2353_v22 }
 0x29c   : > { %v914_v33 = vpop.trf.xlu1  ;;  %v1740_v51 = vadd.f32 %v1739_v3, %v1738_v40  ;;  %v1800_v35 = vadd.f32 %v1799_v10, %v1798_v7  ;;  %v3624_v3 = vld [vmem:[#allocation16_spill] sm:$0xff]  ;;  %v1668_v30 = vmul.f32 %v869_v26, %v869_v26 }
 0x29d   : > { %v1723_v27 = vand.u32 2147483647, %v945_v34  ;;  %v1783_v24 = vmul.f32 %v945_v34, %v945_v34  ;;  %v930_v9 = vsub.f32 %v881_v17, %v914_v33  ;;  %v3623_v17 = vld [vmem:[#allocation14_spill] sm:$0xff]  ;;  %v772_v10 = vsub.f32 %v3319_v41, %v3624_v3  ;;  %v3343_v7 = vld [vmem:[%s3196_s19 + $0x70] sm:$0xff] }
 0x29e   : > { %v770_v14 = vsub.f32 %v3316_v11, %v3623_v17  ;;  %v3625_v34 = vld [vmem:[#allocation18_spill] sm:$0xff]  ;;  %v871_v33 = vmul.f32 %v3266_v20, %v775_v52  ;;  %v1445_v29 = vadd.f32 %v1429_v54, %v2822_v61 }
 0x29f   : > { %v1741_v32 = vsel %vm1615_vm7, %v1723_v27, 0.0  ;;  %v1801_v0 = vsel %vm1615_vm7, %v1783_v24, 0.0  ;;  %v946_v50 = vmul.f32 %v930_v9, %v3242_v46  ;;  %v774_v40 = vsub.f32 %v3322_v6, %v3625_v34  ;;  %v3349_v9 = vld [vmem:[%s3196_s19 + $0x78] sm:$0xff] }
 0x2a0   : > { %v1742_v37 = vadd.f32 %v1741_v32, %v1740_v51  ;;  %v1802_v47 = vadd.f32 %v1801_v0, %v1800_v35  ;;  %v3301_v39 = vpop.trf.xlu1  ;;  %v777_v27 = vsub.f32 %v728_v13, %v2859_v1  ;;  %v778_v24 = vsub.f32 %v729_v15, %v2869_v57  ;;  %v887_v32 = vld [vmem:[%s3276_s20 + $0x50] sm:$0xff]  ;;  %v3626_v0 = vld [vmem:[#allocation21_spill] sm:$0xff]  ;;  %v889_v57 = vld [vmem:[%s3276_s20 + $0x60] sm:$0xff] }
 0x2a1   : > { %v1724_v63 = vand.u32 2147483647, %v946_v50  ;;  %v1784_v18 = vmul.f32 %v946_v50, %v946_v50  ;;  %v1605_v51 = vand.u32 2147483647, %v867_v23  ;;  %v776_v50 = vsub.f32 %v3333_v25, %v3626_v0 }
 0x2a2   : > { %v874_v1 = vmul.f32 %v3270_v4, %v778_v24  ;;  %v1609_v60 = vand.u32 2147483647, %v871_v33  ;;  %v1670_v12 = vmul.f32 %v871_v33, %v871_v33 }
 0x2a3   : > { %v1743_v5 = vsel %vm1615_vm7, %v1724_v63, 0.0  ;;  %v1803_v44 = vsel %vm1615_vm7, %v1784_v18, 0.0  ;;  %v3627_v18 = vld [vmem:[#allocation22_spill] sm:$0xff] }
 0x2a4   : > { %v3297_v16 = vadd.f32 %v1743_v5, %v1742_v37  ;;  %v3299_v58 = vadd.f32 %v1803_v44, %v1802_v47  ;;  %v916_v46 = vpop.trf.xlu1  ;;  %v1666_v37 = vmul.f32 %v867_v23, %v867_v23  ;;  %v1607_v47 = vand.u32 2147483647, %v869_v26 }
 0x2a5   : > { %v932_v35 = vsub.f32 %v883_v2, %v916_v46  ;;  %v779_v5 = vsub.f32 %v3343_v7, %v3627_v18  ;;  %v873_v44 = vmul.f32 %v3268_v21, %v777_v27  ;;  %v780_v46 = vsub.f32 %v3349_v9, %v3628_v59  ;;  %v882_v27 = vld [vmem:[%s3276_s20 + $0x28] sm:$0xff] }
 0x2a6   : > { %v3368_v52 = vsel %vm1615_vm7, %v1666_v37, 0.0  ;;  %v3371_v61 = vsel %vm1615_vm7, %v1607_v47, 0.0  ;;  %v1612_v2 = vand.u32 2147483647, %v874_v1  ;;  %v1673_v33 = vmul.f32 %v874_v1, %v874_v1 }
 0x2a7   : > { %v948_v23 = vmul.f32 %v932_v35, %v3257_v43  ;;  %v1672_v26 = vmul.f32 %v873_v44, %v873_v44  ;;  %v3379_v43 = vsel %vm1615_vm7, %v1609_v60, 0.0 }
 0x2a8   : > { %v3303_v62 = vpop.trf.xlu1 }
 0x2a9   : > { %v1786_v35 = vmul.f32 %v948_v23, %v948_v23 }
 0x2ac   : > { %v918_v56 = vpop.trf.xlu1 }
 0x2ad   : > { %v934_v63 = vsub.f32 %v885_v8, %v918_v56  ;;  %v3364_v56 = vsel %vm1615_vm7, %v1605_v51, 0.0  ;;  %v3376_v8 = vsel %vm1615_vm7, %v1668_v30, 0.0  ;;  %v3384_v51 = vsel %vm1615_vm7, %v1670_v12, 0.0 }
 0x2ae   : > { %v3402_v30 = vsel %vm1615_vm7, %v1673_v33, 0.0  ;;  %v1807_v12 = vsel %vm1615_vm7, %v1786_v35, 0.0 }
 0x2af   : > { %v950_v13 = vmul.f32 %v934_v63, %v3264_v31  ;;  %v1726_v31 = vand.u32 2147483647, %v948_v23  ;;  %v3408_v23 = vld [vmem:[%s3276_s20 + $0x58] sm:$0xff] }
 0x2b0   : > { %v3305_v19 = vpop.trf.xlu1 }
 0x2b1   : > { %v1788_v47 = vmul.f32 %v950_v13, %v950_v13 }
 0x2b4   : > { %v3308_v53 = vpop.trf.xlu1 }
 0x2b5   : > { %v936_v22 = vsub.f32 %v887_v32, %v3308_v53  ;;  %v1611_v53 = vand.u32 2147483647, %v873_v44  ;;  %v884_v32 = vld [vmem:[%s3276_s20 + $0x38] sm:$0xff] }
 0x2b7   : > { %v952_v24 = vmul.f32 %v936_v22, %v3266_v20  ;;  %v3391_v1 = vsel %vm1615_vm7, %v1611_v53, 0.0  ;;  %v3394_v20 = vsel %vm1615_vm7, %v1672_v26, 0.0 }
 0x2b8   : > { %v3325_v38 = vpop.trf.xlu1 }
 0x2b9   : > { %v1730_v60 = vand.u32 2147483647, %v952_v24  ;;  %v937_v11 = vsub.f32 %v3408_v23, %v3325_v38 }
 0x2bc   : > { %v922_v42 = vpop.trf.xlu1 }
 0x2bd   : > { %v938_v15 = vsub.f32 %v889_v57, %v922_v42  ;;  %v3397_v42 = vsel %vm1615_vm7, %v1612_v2, 0.0  ;;  %v931_v57 = vsub.f32 %v882_v27, %v3301_v39 }
 0x2bf   : > { %v954_v63 = vmul.f32 %v938_v15, %v3268_v21  ;;  %v933_v21 = vsub.f32 %v884_v32, %v3303_v62  ;;  %v1811_v62 = vsel %vm1615_vm7, %v1788_v47, 0.0 }
 0x2c1   : > { %v1732_v2 = vand.u32 2147483647, %v954_v63 }
 0x2c3   : > { %v3434_v38 = vsel %vm1615_vm7, %v1732_v2, 0.0 }
 0x2d7   : > { %v1525_v49 = vpop.xlane.xlu0 %1524 }
 0x2d8   : > { %v1541_v28 = vsub.f32 %v1445_v29, %v1525_v49  ;;  %v886_v29 = vld [vmem:[%s3276_s20 + $0x48] sm:$0xff]  ;;  %v1747_v49 = vsel %vm1615_vm7, %v1726_v31, 0.0  ;;  %v3418_v31 = vsel %vm1615_vm7, %v1730_v60, 0.0  ;;  %v1792_v60 = vmul.f32 %v954_v63, %v954_v63 }
 0x2d9   : > { %v935_v26 = vsub.f32 %v886_v29, %v3305_v19 }
 0x2da   : > { %v1557_v54 = vmul.f32 %v3261_v55, %v1541_v28  ;;  %v1728_v55 = vand.u32 2147483647, %v950_v13  ;;  %v923_v28 = vpop.trf.xlu1  ;;  %v890_v13 = vld [vmem:[%s3276_s20 + $0x68] sm:$0xff]  ;;  %v1819_v25 = vsel %vm1615_vm7, %v1792_v60, 0.0 }
 0x2db   : > { %v939_v17 = vsub.f32 %v890_v13, %v923_v28  ;;  %v891_v28 = vld [vmem:[%s3276_s20 + $0x70] sm:$0xff] }
 0x2dc   : > { %v1587_v37 = vsel %vm675_vm0, %v1557_v54, 0.0  ;;  %v1751_v53 = vsel %vm1615_vm7, %v1728_v55, 0.0  ;;  %vm1864_vm0 = vcmask (!%p3497_p13), 58368  }
 0x2dd   : > { %v1588_v44 = vadd.f32 %v1587_v37, %v3227_v36  ;;  %v1790_v36 = vmul.f32 %v952_v24, %v952_v24  ;;  %v3443_v63 = vmul.f32 %v939_v17, %v3270_v4 }
 0x2de   : > { %v924_v23 = vpop.trf.xlu1 }
 0x2df   : > { %1589 = vadd.xlane.f32.xlu0 %v1588_v44  ;;  %v809_v22 = vpop.permute.xlu0 %808  ;;  %v3421_v35 = vsel %vm1615_vm7, %v1790_v36, 0.0  ;;  %v1733_v0 = vand.u32 2147483647, %v3443_v63  ;;  %v1793_v60 = vmul.f32 %v3443_v63, %v3443_v63 }
 0x2e0   : > { %v866_v39 = vmul.f32 %v809_v22, %v770_v14  ;;  %v947_v15 = vmul.f32 %v931_v57, %v809_v22 }
 0x2e2   : > { %v1604_v54 = vand.u32 2147483647, %v866_v39  ;;  %v1665_v33 = vmul.f32 %v866_v39, %v866_v39  ;;  %v1725_v27 = vand.u32 2147483647, %v947_v15  ;;  %v1785_v24 = vmul.f32 %v947_v15, %v947_v15 }
 0x2e3   : > { %v819_v14 = vpop.permute.xlu0 %818 }
 0x2e4   : > { %v1625_v32 = vsel %vm1615_vm7, %v1604_v54, 0.0  ;;  %v1685_v19 = vsel %vm1615_vm7, %v1665_v33, 0.0  ;;  %v1745_v37 = vsel %vm1615_vm7, %v1725_v27, 0.0  ;;  %v1805_v55 = vsel %vm1615_vm7, %v1785_v24, 0.0 }
 0x2e5   : > { %v1626_v47 = vadd.f32 %v1625_v32, %v3249_v45  ;;  %v1686_v44 = vadd.f32 %v1685_v19, %v3251_v48  ;;  %v1746_v57 = vadd.f32 %v1745_v37, %v3297_v16  ;;  %v1806_v29 = vadd.f32 %v1805_v55, %v3299_v58  ;;  %v925_v37 = vpop.trf.xlu1  ;;  %v892_v55 = vld [vmem:[%s3276_s20 + $0x78] sm:$0xff] }
 0x2e6   : > { %v868_v36 = vmul.f32 %v819_v14, %v772_v10  ;;  %v949_v22 = vmul.f32 %v933_v21, %v819_v14  ;;  %v940_v10 = vsub.f32 %v891_v28, %v924_v23 }
 0x2e7   : > { %v1628_v13 = vadd.f32 %v3364_v56, %v1626_v47  ;;  %v1688_v45 = vadd.f32 %v3368_v52, %v1686_v44  ;;  %v1748_v48 = vadd.f32 %v1747_v49, %v1746_v57  ;;  %v1808_v39 = vadd.f32 %v1807_v12, %v1806_v29  ;;  %v829_v16 = vpop.permute.xlu0 %828 }
 0x2e8   : > { %v1606_v15 = vand.u32 2147483647, %v868_v36  ;;  %v1667_v58 = vmul.f32 %v868_v36, %v868_v36  ;;  %v1727_v54 = vand.u32 2147483647, %v949_v22  ;;  %v1787_v2 = vmul.f32 %v949_v22, %v949_v22 }
 0x2e9   : > { %v870_v41 = vmul.f32 %v829_v16, %v774_v40  ;;  %v951_v3 = vmul.f32 %v935_v26, %v829_v16 }
 0x2ea   : > { %v1629_v56 = vsel %vm1615_vm7, %v1606_v15, 0.0  ;;  %v1689_v52 = vsel %vm1615_vm7, %v1667_v58, 0.0  ;;  %v1749_v21 = vsel %vm1615_vm7, %v1727_v54, 0.0  ;;  %v1809_v49 = vsel %vm1615_vm7, %v1787_v2, 0.0 }
 0x2eb   : > { %v1630_v12 = vadd.f32 %v1629_v56, %v1628_v13  ;;  %v1690_v33 = vadd.f32 %v1689_v52, %v1688_v45  ;;  %v1750_v27 = vadd.f32 %v1749_v21, %v1748_v48  ;;  %v1810_v4 = vadd.f32 %v1809_v49, %v1808_v39  ;;  %v839_v24 = vpop.permute.xlu0 %838 }
 0x2ec   : > { %v1608_v17 = vand.u32 2147483647, %v870_v41  ;;  %v1669_v14 = vmul.f32 %v870_v41, %v870_v41  ;;  %v1729_v6 = vand.u32 2147483647, %v951_v3  ;;  %v1789_v34 = vmul.f32 %v951_v3, %v951_v3 }
 0x2ed   : > { %v1632_v40 = vadd.f32 %v3371_v61, %v1630_v12  ;;  %v1692_v26 = vadd.f32 %v3376_v8, %v1690_v33  ;;  %v1752_v32 = vadd.f32 %v1751_v53, %v1750_v27  ;;  %v1812_v19 = vadd.f32 %v1811_v62, %v1810_v4 }
 0x2ee   : > { %v1633_v47 = vsel %vm1615_vm7, %v1608_v17, 0.0  ;;  %v1693_v44 = vsel %vm1615_vm7, %v1669_v14, 0.0  ;;  %v1753_v57 = vsel %vm1615_vm7, %v1729_v6, 0.0  ;;  %v1813_v29 = vsel %vm1615_vm7, %v1789_v34, 0.0 }
 0x2ef   : > { %v1634_v36 = vadd.f32 %v1633_v47, %v1632_v40  ;;  %v1694_v22 = vadd.f32 %v1693_v44, %v1692_v26  ;;  %v1754_v23 = vadd.f32 %v1753_v57, %v1752_v32  ;;  %v1814_v28 = vadd.f32 %v1813_v29, %v1812_v19  ;;  %v854_v13 = vpop.permute.xlu0 %853 }
 0x2f0   : > { %v872_v61 = vmul.f32 %v839_v24, %v776_v50  ;;  %v953_v8 = vmul.f32 %v937_v11, %v839_v24  ;;  %v875_v53 = vmul.f32 %v854_v13, %v779_v5  ;;  %v941_v62 = vsub.f32 %v892_v55, %v925_v37 }
 0x2f1   : > { %v1636_v45 = vadd.f32 %v3379_v43, %v1634_v36  ;;  %v1696_v48 = vadd.f32 %v3384_v51, %v1694_v22  ;;  %v1756_v39 = vadd.f32 %v3418_v31, %v1754_v23  ;;  %v1816_v16 = vadd.f32 %v3421_v35, %v1814_v28 }
 0x2f2   : > { %v1610_v15 = vand.u32 2147483647, %v872_v61  ;;  %v1671_v58 = vmul.f32 %v872_v61, %v872_v61  ;;  %v1731_v54 = vand.u32 2147483647, %v953_v8  ;;  %v1791_v2 = vmul.f32 %v953_v8, %v953_v8 }
 0x2f3   : > { %v956_v50 = vmul.f32 %v940_v10, %v854_v13  ;;  %v1613_v7 = vand.u32 2147483647, %v875_v53  ;;  %v859_v18 = vpop.permute.xlu0 %858  ;;  %v1674_v56 = vmul.f32 %v875_v53, %v875_v53  ;;  %v1761_v33 = vsel %vm1615_vm7, %v1733_v0, 0.0 }
 0x2f4   : > { %v1637_v5 = vsel %vm1615_vm7, %v1610_v15, 0.0  ;;  %v1697_v43 = vsel %vm1615_vm7, %v1671_v58, 0.0  ;;  %v1757_v51 = vsel %vm1615_vm7, %v1731_v54, 0.0  ;;  %v1817_v31 = vsel %vm1615_vm7, %v1791_v2, 0.0 }
 0x2f5   : > { %v1638_v35 = vadd.f32 %v1637_v5, %v1636_v45  ;;  %v1698_v11 = vadd.f32 %v1697_v43, %v1696_v48  ;;  %v1758_v41 = vadd.f32 %v1757_v51, %v1756_v39  ;;  %v1818_v3 = vadd.f32 %v1817_v31, %v1816_v16 }
 0x2f6   : > { %v876_v10 = vmul.f32 %v859_v18, %v780_v46  ;;  %v957_v52 = vmul.f32 %v941_v62, %v859_v18  ;;  %v1643_v27 = vsel %vm1615_vm7, %v1613_v7, 0.0  ;;  %v1734_v4 = vand.u32 2147483647, %v956_v50 }
 0x2f7   : > { %v1640_v21 = vadd.f32 %v3391_v1, %v1638_v35  ;;  %v1700_v49 = vadd.f32 %v3394_v20, %v1698_v11  ;;  %v1760_v12 = vadd.f32 %v3434_v38, %v1758_v41  ;;  %v1820_v59 = vadd.f32 %v1819_v25, %v1818_v3 }
 0x2f8   : > { %v1614_v24 = vand.u32 2147483647, %v876_v10  ;;  %v1675_v17 = vmul.f32 %v876_v10, %v876_v10  ;;  %v1735_v46 = vand.u32 2147483647, %v957_v52  ;;  %v1703_v1 = vsel %vm1615_vm7, %v1674_v56, 0.0 }
 0x2f9   : > { %v1702_v63 = vadd.f32 %v3402_v30, %v1700_v49  ;;  %v1642_v14 = vadd.f32 %v3397_v42, %v1640_v21  ;;  %v1762_v9 = vadd.f32 %v1761_v33, %v1760_v12  ;;  %v1794_v40 = vmul.f32 %v956_v50, %v956_v50  ;;  %v1855_v33 = vld [vmem:[%s3630_s2] sm:$0x3] (!%p3497_p13) }
 0x2fa   : > { %v1705_v20 = vsel %vm1615_vm7, %v1675_v17, 0.0  ;;  %v1645_v38 = vsel %vm1615_vm7, %v1614_v24, 0.0  ;;  %v1763_v26 = vsel %vm1615_vm7, %v1734_v4, 0.0  ;;  %v1821_v32 = vsel %vm1615_vm7, %v1793_v60, 0.0 }
 0x2fb   : > { %v1704_v6 = vadd.f32 %v1703_v1, %v1702_v63  ;;  %v1644_v34 = vadd.f32 %v1643_v27, %v1642_v14  ;;  %v1764_v19 = vadd.f32 %v1763_v26, %v1762_v9  ;;  %v1822_v37 = vadd.f32 %v1821_v32, %v1820_v59  ;;  %v1857_v27 = vld [vmem:[%s3631_s1] sm:$0x3] (!%p3497_p13) }
 0x2fc   : > { %v1795_v55 = vmul.f32 %v957_v52, %v957_v52  ;;  %v1765_v47 = vsel %vm1615_vm7, %v1735_v46, 0.0  ;;  %v1823_v44 = vsel %vm1615_vm7, %v1794_v40, 0.0  ;;  %v1865_v4 = vsel (!%p3497_p13), %vm1864_vm0, %v1855_v33, 0.0  ;;  %v1856_v63 = vld [vmem:[%s3632_s0] sm:$0x3] (!%p3497_p13) }
 0x2fd   : > { %v1706_v30 = vadd.f32 %v1705_v20, %v1704_v6  ;;  %v1646_v42 = vadd.f32 %v1645_v38, %v1644_v34  ;;  %v1766_v57 = vadd.f32 %v1765_v47, %v1764_v19  ;;  %v1824_v29 = vadd.f32 %v1823_v44, %v1822_v37 }
 0x2fe   : > { %v1825_v36 = vsel %vm1615_vm7, %v1795_v55, 0.0  ;;  %vm1858_vm8 = vcmp.gt.f32.partialorder (!%p3497_p13), %v1855_v33, 0.0 }
 0x2ff   : > { %1707 = vadd.xlane.f32.xlu0 %v1706_v30  ;;  %1647 = vadd.xlane.f32.xlu1 %v1646_v42  ;;  %v1826_v22 = vadd.f32 %v1825_v36, %v1824_v29  ;;  %v1859_v24 = vsel (!%p3497_p13), %vm1858_vm8, %v1857_v27, 1.0 }
 0x300   : > { %2372 = vlog2.f32 (!%p3497_p13), %v1859_v24 }
 0x303   : > { %1767 = vadd.xlane.f32.xlu0 %v1766_v57 }
 0x307   : > { %1827 = vadd.xlane.f32.xlu0 %v1826_v22 }
 0x30a   : > { %v2373_v17 = vpop.eup (!%p3497_p13), %2372 }
 0x30b   : > { %1866 = vadd.xlane.f32.xlu0 (!%p3497_p13), %v1865_v4  ;;  %v1861_v14 = vmul.f32 (!%p3497_p13), 0.6931472, %v2373_v17 }
 0x30d   : > { %v1862_v9 = vsub.f32 (!%p3497_p13), %v1856_v63, %v1861_v14 }
 0x30f   : > { %v1863_v59 = vmul.f32 (!%p3497_p13), %v1862_v9, %v1855_v33 }
 0x311   : > { %v1891_v46 = vmul.f32 (!%p3497_p13), %v1863_v59, %v1863_v59  ;;  %v1876_v1 = vand.u32 (!%p3497_p13), 2147483647, %v1863_v59 }
 0x313   : > { %v1892_v20 = vsel (!%p3497_p13), %vm1864_vm0, %v1891_v46, 0.0  ;;  %v1877_v38 = vsel (!%p3497_p13), %vm1864_vm0, %v1876_v1, 0.0 }
 0x314   : > { %1893 = vadd.xlane.f32.xlu1 (!%p3497_p13), %v1892_v20  ;;  %1878 = vadd.xlane.f32.xlu0 (!%p3497_p13), %v1877_v38 }
 0x36c   : > { %v1590_v23 = vpop.xlane.xlu0 %1589 }
 0x36d   : > { %v1591_v28 = vrot.slane %v1590_v23, 4 }
 0x36f   : > { %v1592_v13 = vadd.f32 %v1591_v28, %v1590_v23 }
 0x371   : > { %v1593_v61 = vrot.slane %v1592_v13, 2 }
 0x373   : > { %v1594_v8 = vadd.f32 %v1593_v61, %v1592_v13 }
 0x375   : > { %v1595_v53 = vrot.slane %v1594_v8, 1 }
 0x377   : > { %v1596_v62 = vadd.f32 %v1595_v53, %v1594_v8 }
 0x379   : > { %2174 = vpush %v1596_v62 }
 0x38c   : > { %v1708_v45 = vpop.xlane.xlu0 %1707  ;;  %v1648_v48 = vpop.xlane.xlu1 %1647 }
 0x38d   : > { %v1709_v39 = vrot.slane %v1708_v45, 4  ;;  %v1649_v16 = vrot.slane %v1648_v48, 4 }
 0x38f   : > { %v1710_v15 = vadd.f32 %v1709_v39, %v1708_v45  ;;  %v1650_v58 = vadd.f32 %v1649_v16, %v1648_v48 }
 0x390   : > { %v1768_v54 = vpop.xlane.xlu0 %1767 }
 0x391   : > { %v1711_v2 = vrot.slane %v1710_v15, 2  ;;  %v1651_v25 = vrot.slane %v1650_v58, 2  ;;  %v1769_v0 = vrot.slane %v1768_v54, 4 }
 0x393   : > { %v1652_v50 = vadd.f32 %v1651_v25, %v1650_v58  ;;  %v1770_v7 = vadd.f32 %v1769_v0, %v1768_v54  ;;  %v1712_v18 = vadd.f32 %v1711_v2, %v1710_v15 }
 0x394   : > { %v1828_v5 = vpop.xlane.xlu0 %1827 }
 0x395   : > { %v1771_v43 = vrot.slane %v1770_v7, 2  ;;  %v1829_v51 = vrot.slane %v1828_v5, 4  ;;  %v1653_v31 = vrot.slane %v1652_v50, 1  ;;  %v1713_v35 = vrot.slane %v1712_v18, 1 }
 0x397   : > { %v1830_v11 = vadd.f32 %v1829_v51, %v1828_v5  ;;  %v1654_v41 = vadd.f32 %v1653_v31, %v1652_v50  ;;  %v1714_v3 = vadd.f32 %v1713_v35, %v1712_v18  ;;  %v1772_v60 = vadd.f32 %v1771_v43, %v1770_v7 }
 0x398   : > { %v1867_v6 = vpop.xlane.xlu0 (!%p3497_p13), %1866 }
 0x399   : > { %v1831_v56 = vrot.slane %v1830_v11, 2  ;;  %2176 = vpush %v1654_v41  ;;  %v1773_v10 = vrot.slane %v1772_v60, 1  ;;  %v1868_v34 = vrot.slane (!%p3497_p13), %v1867_v6, 4 }
 0x39a   : > { %2178 = vpush %v1714_v3 }
 0x39b   : > { %v1832_v52 = vadd.f32 %v1831_v56, %v1830_v11  ;;  %v1774_v21 = vadd.f32 %v1773_v10, %v1772_v60  ;;  %v1869_v40 = vadd.f32 (!%p3497_p13), %v1868_v34, %v1867_v6 }
 0x39d   : > { %2180 = vpush %v1774_v21  ;;  %v1833_v49 = vrot.slane %v1832_v52, 1  ;;  %v1870_v26 = vrot.slane (!%p3497_p13), %v1869_v40, 2 }
 0x39f   : > { %v1834_v12 = vadd.f32 %v1833_v49, %v1832_v52  ;;  %v1871_v32 = vadd.f32 (!%p3497_p13), %v1870_v26, %v1869_v40 }
 0x3a1   : > { %2182 = vpush %v1834_v12  ;;  %v1872_v30 = vrot.slane (!%p3497_p13), %v1871_v32, 1  ;;  %v1879_v19 = vpop.xlane.xlu0 (!%p3497_p13), %1878  ;;  %v1894_v36 = vpop.xlane.xlu1 (!%p3497_p13), %1893 }
 0x3a2   : > { %v1880_v37 = vrot.slane (!%p3497_p13), %v1879_v19, 4  ;;  %v1895_v22 = vrot.slane (!%p3497_p13), %v1894_v36, 4 }
 0x3a3   : > { %v1873_v42 = vadd.f32 (!%p3497_p13), %v1872_v30, %v1871_v32 }
 0x3a4   : > { %v1881_v55 = vadd.f32 (!%p3497_p13), %v1880_v37, %v1879_v19  ;;  %v1896_v23 = vadd.f32 (!%p3497_p13), %v1895_v22, %v1894_v36 }
 0x3a5   : > { %2184 = vpush (!%p3497_p13), %v1873_v42 }
 0x3a6   : > { %v1882_v47 = vrot.slane (!%p3497_p13), %v1881_v55, 2  ;;  %v1897_v13 = vrot.slane (!%p3497_p13), %v1896_v23, 2 }
 0x3a8   : > { %v1883_v44 = vadd.f32 (!%p3497_p13), %v1882_v47, %v1881_v55  ;;  %v1898_v53 = vadd.f32 (!%p3497_p13), %v1897_v13, %v1896_v23 }
 0x3aa   : > { %s2175_s22 = spop %2174  ;;  %v1884_v57 = vrot.slane (!%p3497_p13), %v1883_v44, 1  ;;  %v1899_v62 = vrot.slane (!%p3497_p13), %v1898_v53, 1 }
 0x3ab   : > { %s1840_s27 = sadd.f32 %s2175_s22, %s2161_s21 }
 0x3ac   : > { %v1885_v29 = vadd.f32 (!%p3497_p13), %v1884_v57, %v1883_v44  ;;  %v1900_v39 = vadd.f32 (!%p3497_p13), %v1899_v62, %v1898_v53 }
 0x3ad   : > { %1842 = sst [smem:[#allocation2 + $0x4]] %s1840_s27 }
 0x3ae   : > { %2186 = vpush (!%p3497_p13), %v1885_v29  ;;  %s2167_s16 = sld [smem:[#allocation2 + $0x4]] (!%p3497_p13) }
 0x3ca   : > { %s2177_s26 = spop %2176 }
 0x3cb   : > { %s1656_s29 = sadd.f32 %s2177_s26, %s1598_s13  ;;  %s2179_s30 = spop %2178 }
 0x3cc   : > { %s1716_s17 = sadd.f32 %s2179_s30, %s2158_s14  ;;  %s2438_s14 = smov (!%p3497_p13), 1.0  }
 0x3cd   : > { %1658 = sst [smem:[#allocation2]] %s1656_s29 }
 0x3ce   : > { %1718 = sst [smem:[#allocation2 + $0x1]] %s1716_s17  ;;  %s2181_s18 = spop %2180 }
 0x3cf   : > { %s1776_s15 = sadd.f32 %s2181_s18, %s2159_s24  ;;  %1852 = sbr.rel (%p3497_p13) target bundleno = 1065 (0x429), region = 76 }
 0x3d0   : > { %s1854_s24 = smax.f32 (!%p3497_p13), %s2438_s14, %s2163_s23  ;;  %s1906_s30 = sld [smem:[#allocation2]] (!%p3497_p13) }
 0x3d1   : > { %1778 = sst [smem:[#allocation2 + $0x2]] %s1776_s15  ;;  %s1907_s26 = smul.f32 (!%p3497_p13), 8.0, %s1854_s24  ;;  %v1934_v61 = vstv (!%p3497_p13), %s1854_s24 }
 0x3d2   : > { %s2183_s19 = spop %2182  ;;  %s2164_s17 = sld [smem:[#allocation2 + $0x1]] (!%p3497_p13) }
 0x3d3   : > { %s1836_s12 = sadd.f32 %s2183_s19, %s2160_s28  ;;  %v1908_v28 = vstv (!%p3497_p13), %s1907_s26  ;;  %s2165_s18 = sld [smem:[#allocation2 + $0x2]] (!%p3497_p13) }
 0x3d4   : > { %2374 = vrcp.f32 (!%p3497_p13), %v1908_v28 }
 0x3d5   : > { %1838 = sst [smem:[#allocation2 + $0x3]] %s1836_s12 }
 0x3d6   : > { %s2185_s28 = spop %2184  ;;  %s2166_s15 = sld [smem:[#allocation2 + $0x3]] }
 0x3d7   : > { %s1875_s29 = smax.f32 %s2438_s14, %s2185_s28 }
 0x3d8   : > { %v1887_v8 = vstv %s1875_s29 }
 0x3d9   : > { %2376 = vrcp.f32 %v1887_v8 }
 0x3da   : > { %2378 = vrcp.f32 %v1934_v61 }
 0x3de   : > { %v2375_v45 = vpop.eup %2374 }
 0x3df   : > { %s2187_s19 = spop %2186 }
 0x3e3   : > { %v2377_v48 = vpop.eup %2376 }
 0x3e4   : > { %v2379_v16 = vpop.eup %2378  ;;  %2188 = vpush %v2377_v48 }
 0x3e5   : > { %2190 = vpush %v1900_v39 }
 0x3e6   : > { %2192 = vpush %v2375_v45 }
 0x3e7   : > { %2194 = vpush %v2379_v16 }
 0x415   : > { %s2189_s12 = spop %2188 }
 0x416   : > { %s1890_s20 = smul.f32 %s2189_s12, %s2187_s19  ;;  %s2191_s21 = spop %2190 }
 0x417   : > { %s1905_s22 = smul.f32 %s2191_s21, %s2189_s12  ;;  %s2193_s27 = spop %2192 }
 0x418   : > { %1955 = sst [smem:[#allocation3 + $0x5]] %s1890_s20  ;;  %s1911_s13 = smul.f32 %s2193_s27, %s1906_s30 }
 0x419   : > { %1957 = sst [smem:[#allocation3 + $0x6]] %s1905_s22  ;;  %s1916_s23 = smul.f32 %s2193_s27, %s2164_s17 }
 0x41a   : > { %s1921_s14 = smul.f32 %s2193_s27, %s2165_s18  ;;  %1947 = sst [smem:[#allocation3 + $0x1]] %s1911_s13 }
 0x41b   : > { %s1929_s24 = smul.f32 %s2193_s27, %s2166_s15  ;;  %s1938_s26 = sadd.f32 %s1916_s23, %s1911_s13 }
 0x41c   : > { %s1924_s28 = smul.f32 0.02, %s1921_s14  ;;  %1949 = sst [smem:[#allocation3 + $0x2]] %s1916_s23 }
 0x41d   : > { %s1932_s29 = smul.f32 0.02, %s1929_s24  ;;  %s2195_s0 = spop %2194 }
 0x41e   : > { %s1939_s1 = sadd.f32 %s1938_s26, %s1924_s28  ;;  %s1937_s2 = smul.f32 %s2195_s0, %s2167_s16 }
 0x41f   : > { %1951 = sst [smem:[#allocation3 + $0x3]] %s1924_s28 }
 0x420   : > { %s1940_s3 = sadd.f32 %s1939_s1, %s1932_s29 }
 0x421   : > { %1953 = sst [smem:[#allocation3 + $0x4]] %s1932_s29 }
 0x422   : > { %s1941_s19 = sadd.f32 %s1940_s3, %s1890_s20 }
 0x423   : > { %1959 = sst [smem:[#allocation3 + $0x7]] %s1937_s2 }
 0x424   : > { %s1942_s12 = sadd.f32 %s1941_s19, %s1905_s22 }
 0x426   : > { %s1943_s21 = sadd.f32 %s1942_s12, %s1937_s2 }
 0x428   : > { %1945 = sst [smem:[#allocation3]] %s1943_s21 }
 0x429 PF: > { %s3633_s30 = sadd.s32 4294967295, %s2434_s25   ;;  %s3634_s15 = sld [smem:[#allocation28_spill]] }
 0x42a   : > { %p2209_p0 = scmp.eq.s32.totalorder %s3633_s30, 3 }
 0x42f   : > { %s2380_s27 = scalar_lea.hbm %s3634_s15, 16 }
 0x430   : > { %p2381_p1 = scmp.ne.s32.totalorder %s3634_s15, %s2380_s27  ;;  %p2386_p4 = scmp.lt.u32.totalorder %s2380_s27, %s3634_s15 }
 0x432   : > { %p2382_p2 = pnand %p2381_p1, %p2209_p0 }
 0x434   : > { %p2383_p3 = pneg %p2382_p2 }
 0x436   : > { %p2388_p5 = pnand %p2386_p4, %p2383_p3 }
 0x438   : > { %2391 = shalt.err (!%p2388_p5)
}
 0x439   : > { %s2439_s2 = smov [#allocation3]  }
 0x43a   : > { %2206 = dma.smem_to_hbm (%p2209_p0), %s2439_s2, 16, %s3634_s15, [#allocation4]  }
 0x43b   : > { %2413 = dma.done.wait (%p2209_p0), [#allocation4], 16  }
 0x43c   : > { %2415 = vsyncadd (%p2209_p0), [#allocation4], 4294967280 }
 0x43d   : > { %1973 = sfence }
 0x43e PF: > { %s23_s25 = sadd.s32 1, %s2434_s25   ;;  %s3635_s21 = sld [smem:[#allocation6_spill]] }
 0x43f   : > { %p20_p6 = scmp.ge.s32.totalorder %s23_s25, 6   ;;  %s3636_s22 = sld [smem:[#allocation7_spill]] }
 0x440   : > { %s3637_s23 = sld [smem:[#allocation8_spill]]  ;;  %s3638_s24 = sld [smem:[#allocation9_spill]] }
 0x441   :  { %22 = sbr.rel (!%p20_p6) target bundleno = 9 (0x9), region = 143 }
 0x448   :  { %1979 = vsyncpa [#allocation4], 1 }
 0x449   :  { %1981 = vsyncpa [#allocation4 + $0x1], 1 }

</bundles_post_ra>
